<compile_context>
chip_gen: v7x
topology: tpu7x:2x2x1
jax: 0.10.0
libtpu: 0.0.40
codegen_flags: <defaults>
</compile_context>

<pallas_src>
import functools

import jax
import jax.numpy as jnp
from jax.experimental import pallas as pl
from jax.experimental.pallas import tpu as pltpu


def _swish(x):
    return x * jax.nn.sigmoid(x)


def decoder_cell_kernel(x_ref, aux_ref, pe_ref, pc_ref, ph_ref, out_ref, *, W):
    """One batch tile.  x_ref: (C, P) with P = BT*H*W pixels in the lane axis."""
    C, P = x_ref.shape
    E = pe_ref.shape[0]
    Hd = ph_ref.shape[0]
    BT = aux_ref.shape[0] - 9          # images in this tile (9 tap-mask rows)

    x = x_ref[...]                                            # (C, P)

    # --- packed, BN-folded parameters (channels-first) ---
    we_t = pe_ref[:, 0:C]                                     # (E, C) expand (BN1/BN2 folded)
    wp_t = pe_ref[:, C:C + E]                                 # (E, E) pointwise (BN3 folded)
    dw_w = pe_ref[:, C + E:C + E + 9]                         # (E, 9) depthwise taps
    be = pe_ref[:, C + E + 9:C + E + 10]                      # (E, 1)
    bp = pe_ref[:, C + E + 10:C + E + 11]                     # (E, 1)
    wr_t = pc_ref[:, 0:E]                                     # (C, E) project (BN4 folded)
    se_w2t = pc_ref[:, E:E + Hd]                              # (C, Hd)
    br = pc_ref[:, E + Hd:E + Hd + 1]                         # (C, 1)
    se_b2 = pc_ref[:, E + Hd + 1:E + Hd + 2]                  # (C, 1)
    se_w1t = ph_ref[:, 0:C]                                   # (Hd, C) (1/(H*W) folded in)
    se_b1 = ph_ref[:, C:C + 1]                                # (Hd, 1)

    # --- 1x1 expand conv (+ folded BN1/BN2) + Swish ---
    h = jnp.dot(we_t, x, preferred_element_type=jnp.float32) + be      # (E, P)
    h = _swish(h)

    # --- depthwise 3x3, padding=1: XLU lane rolls + per-tap border masks ---
    acc = jnp.zeros((E, P), dtype=jnp.float32)
    for dy in (-1, 0, 1):
        for dx in (-1, 0, 1):
            k = (dy + 1) * 3 + (dx + 1)
            s = dy * W + dx                                   # flat-pixel offset of this tap
            t = h if s == 0 else pltpu.roll(h, shift=(-s) % P, axis=1)
            if k != 4:                                        # center tap always valid
                t = t * aux_ref[BT + k:BT + k + 1, :]         # (1, P) validity mask
            acc = acc + t * dw_w[:, k:k + 1]

    # --- pointwise 1x1 conv (+ folded depthwise bias / BN3) + Swish ---
    h = jnp.dot(wp_t, acc, preferred_element_type=jnp.float32) + bp     # (E, P)
    h = _swish(h)

    # --- 1x1 project conv (+ folded BN4) ---
    h = jnp.dot(wr_t, h, preferred_element_type=jnp.float32) + br       # (C, P)

    # --- SE: segmented global pool + FC1/ReLU/FC2/sigmoid, all on the MXU ---
    sel = aux_ref[0:BT, :]                                    # (BT, P), 1.0 on image n's lanes
    pooled = jax.lax.dot_general(                             # (C, BT) per-image pixel sums
        h, sel, (((1,), (1,)), ((), ())),
        preferred_element_type=jnp.float32)
    g = jnp.dot(se_w1t, pooled, preferred_element_type=jnp.float32) + se_b1  # (Hd, BT)
    g = jnp.maximum(g, 0.0)
    g = jnp.dot(se_w2t, g, preferred_element_type=jnp.float32) + se_b2       # (C, BT)
    g = jax.nn.sigmoid(g)
    gate = jnp.dot(g, sel, preferred_element_type=jnp.float32)               # (C, P)

    # --- SE scale + residual ---
    out_ref[...] = (h * gate + x).astype(out_ref.dtype)


def fold_params(params, H, W):
    """Fold BN scale/shift + depthwise bias into adjacent convs and pack into
    three channels-first parameter slabs."""
    (bn1_s, bn1_b, w_exp, b_exp, bn2_s, bn2_b, dw_w, dw_b,
     pw_w, pw_b, bn3_s, bn3_b, w_proj, b_proj, bn4_s, bn4_b,
     se_w1, se_b1, se_w2, se_b2) = params
    s1, b1 = bn1_s[0], bn1_b[0]
    s2, b2 = bn2_s[0], bn2_b[0]
    s3, b3 = bn3_s[0], bn3_b[0]
    s4, b4 = bn4_s[0], bn4_b[0]

    # swish(BN2(conv1x1(BN1(x))))  ->  swish(x @ we_f + be_f)
    we_f = (s1[:, None] * w_exp) * s2[None, :]                 # (C, E)
    be_f = (b1 @ w_exp + b_exp[0]) * s2 + b2                   # (E,)
    # swish(BN3(pw(dw(x) + dw_b)))  ->  swish(dw(x) @ wp_f + bp_f)
    wp_f = pw_w * s3[None, :]                                  # (E, E)
    bp_f = (dw_b[0] @ pw_w + pw_b[0]) * s3 + b3                # (E,)
    # BN4(conv1x1(x))  ->  x @ wr_f + br_f
    wr_f = w_proj * s4[None, :]                                # (E, C)
    br_f = b_proj[0] * s4 + b4                                 # (C,)

    p_e = jnp.concatenate(
        [we_f.T, wp_f.T, dw_w.T, be_f[:, None], bp_f[:, None]], axis=1)       # (E, C+E+11)
    p_c = jnp.concatenate(
        [wr_f.T, se_w2.T, br_f[:, None], se_b2[0][:, None]], axis=1)          # (C, E+Hd+2)
    p_h = jnp.concatenate(
        [se_w1.T / float(H * W), se_b1[0][:, None]], axis=1)                  # (Hd, C+1)
    return p_e, p_c, p_h


def decoder_cell_pallas(x, params, *, images_per_step=None):
    """x: (N, H, W, C) float32; params: raw (BN, conv, SE) parameter tuple."""
    N, H, W, C = x.shape
    HW = H * W
    p_e, p_c, p_h = fold_params(params, H, W)

    BT = N if images_per_step is None else images_per_step
    assert N % BT == 0
    P = BT * HW
    assert P % 128 == 0 or BT == N     # lane-dense blocks

    # channels-first, flat-pixel layout: pixel p = n*H*W + h*W + w in the lane axis.
    x_cf = jnp.transpose(x, (3, 0, 1, 2)).reshape(C, N * HW).astype(jnp.float32)

    # aux rows: [0:BT]    per-image selector (1.0 on that image's pixels)
    #           [BT:BT+9] per-tap depthwise border-validity masks (k = (dy+1)*3+(dx+1))
    sel = jnp.repeat(jnp.eye(BT, dtype=jnp.float32), HW, axis=1)               # (BT, P)
    w_idx = jnp.arange(HW, dtype=jnp.int32) % W
    h_idx = jnp.arange(HW, dtype=jnp.int32) // W
    tap_masks = []
    for dy in (-1, 0, 1):
        for dx in (-1, 0, 1):
            valid = ((h_idx + dy >= 0) & (h_idx + dy < H)
                     & (w_idx + dx >= 0) & (w_idx + dx < W))
            tap_masks.append(valid)
    masks = jnp.stack(tap_masks).astype(jnp.float32)                           # (9, HW)
    masks = jnp.tile(masks, (1, BT))                                           # (9, P)
    aux = jnp.concatenate([sel, masks], axis=0)                                # (BT+9, P)

    kernel = functools.partial(decoder_cell_kernel, W=W)

    out_cf = pl.pallas_call(
        kernel,
        out_shape=jax.ShapeDtypeStruct((C, N * HW), jnp.float32),
        grid_spec=pltpu.PrefetchScalarGridSpec(
            num_scalar_prefetch=0,
            grid=(N // BT,),
            in_specs=[
                pl.BlockSpec((C, P), lambda b: (0, b)),
                pl.BlockSpec(aux.shape, lambda b: (0, 0)),
                pl.BlockSpec(p_e.shape, lambda b: (0, 0)),
                pl.BlockSpec(p_c.shape, lambda b: (0, 0)),
                pl.BlockSpec(p_h.shape, lambda b: (0, 0)),
            ],
            out_specs=pl.BlockSpec((C, P), lambda b: (0, b)),
        ),
        compiler_params=pltpu.CompilerParams(
            # batch tiles are independent -> shard across TensorCores (v7x megacore)
            dimension_semantics=("parallel",),
            vmem_limit_bytes=32 * 1024 * 1024,
        ),
    )(x_cf, aux, p_e, p_c, p_h)

    return out_cf.reshape(C, N, H, W).transpose(1, 2, 3, 0)


def make_params(key, C, E, Hd):
    ks = list(jax.random.split(key, 16))
    eps = 1e-5

    def rnd(k, shape, scale=0.1):
        return jax.random.normal(k, shape, dtype=jnp.float32) * scale

    def bn(k, ch):
        k1, k2 = jax.random.split(k)
        gamma = 1.0 + rnd(k1, (ch,), 0.05)
        beta = rnd(k2, (ch,), 0.05)
        mean = jnp.zeros((ch,), jnp.float32)
        var = jnp.ones((ch,), jnp.float32)
        scale = gamma / jnp.sqrt(var + eps)
        shift = beta - mean * scale
        return scale.reshape(1, ch), shift.reshape(1, ch)

    bn1_s, bn1_b = bn(ks[0], C)
    w_exp = rnd(ks[1], (C, E))
    b_exp = rnd(ks[2], (1, E))
    bn2_s, bn2_b = bn(ks[3], E)
    dw_w = rnd(ks[4], (9, E))          # (ky*3+kx, E), depthwise 3x3 weights
    dw_b = rnd(ks[5], (1, E))
    pw_w = rnd(ks[6], (E, E))
    pw_b = rnd(ks[7], (1, E))
    bn3_s, bn3_b = bn(ks[8], E)
    w_proj = rnd(ks[9], (E, C))
    b_proj = rnd(ks[10], (1, C))
    bn4_s, bn4_b = bn(ks[11], C)
    se_w1 = rnd(ks[12], (C, Hd))
    se_b1 = rnd(ks[13], (1, Hd))
    se_w2 = rnd(ks[14], (Hd, C))
    se_b2 = rnd(ks[15], (1, C))

    return (bn1_s, bn1_b, w_exp, b_exp, bn2_s, bn2_b, dw_w, dw_b,
            pw_w, pw_b, bn3_s, bn3_b, w_proj, b_proj, bn4_s, bn4_b,
            se_w1, se_b1, se_w2, se_b2)


def decoder_cell_ref(x, params):
    """Pure-JAX reference (NHWC) on the raw (un-folded) parameters."""
    (bn1_s, bn1_b, w_exp, b_exp, bn2_s, bn2_b, dw_w, dw_b,
     pw_w, pw_b, bn3_s, bn3_b, w_proj, b_proj, bn4_s, bn4_b,
     se_w1, se_b1, se_w2, se_b2) = params
    N, H, W, C = x.shape
    E = w_exp.shape[1]

    h = x * bn1_s[0] + bn1_b[0]
    h = jnp.einsum("nhwc,ce->nhwe", h, w_exp) + b_exp[0]
    h = _swish(h * bn2_s[0] + bn2_b[0])
    hp = jnp.pad(h, ((0, 0), (1, 1), (1, 1), (0, 0)))
    acc = jnp.zeros((N, H, W, E), jnp.float32)
    for dy in range(3):
        for dx in range(3):
            acc = acc + hp[:, dy:dy + H, dx:dx + W, :] * dw_w[dy * 3 + dx]
    h = acc + dw_b[0]
    h = jnp.einsum("nhwe,ef->nhwf", h, pw_w) + pw_b[0]
    h = _swish(h * bn3_s[0] + bn3_b[0])
    h = jnp.einsum("nhwe,ec->nhwc", h, w_proj) + b_proj[0]
    h = h * bn4_s[0] + bn4_b[0]
    s = jnp.mean(h, axis=(1, 2))                      # (N, C)
    s = jnp.maximum(s @ se_w1 + se_b1[0], 0.0)
    s = jax.nn.sigmoid(s @ se_w2 + se_b2[0])
    h = h * s[:, None, None, :]
    return h + x


if __name__ == "__main__":
    N, C, E, H, W = 2, 4, 16, 16, 16
    Hd = max(C // 2, 2)                               # SE hidden width (assumed ratio)

    key = jax.random.PRNGKey(0)
    kx, kp = jax.random.split(key)
    x = jax.random.normal(kx, (N, H, W, C), dtype=jnp.float32)
    params = make_params(kp, C, E, Hd)

    out = decoder_cell_pallas(x, params)
    out = jax.block_until_ready(out)

    ref = decoder_cell_ref(x, params)
    assert out.shape == (N, H, W, C)
    assert jnp.allclose(out, ref, atol=2e-3, rtol=2e-3), (
        float(jnp.max(jnp.abs(out - ref))))

    print("KERNEL_OK")
</pallas_src>

<mosaic_0001>
module attributes {stable_mosaic.version = 11 : i64} {
  func.func @decoder_cell_kernel(%arg0: i32, %arg1: memref<4x512xf32, #tpu.memory_space<vmem>>, %arg2: memref<11x512xf32, #tpu.memory_space<vmem>>, %arg3: memref<16x31xf32, #tpu.memory_space<vmem>>, %arg4: memref<4x20xf32, #tpu.memory_space<vmem>>, %arg5: memref<2x5xf32, #tpu.memory_space<vmem>>, %arg6: memref<4x512xf32, #tpu.memory_space<vmem>>) attributes {dimension_semantics = [#tpu.dimension_semantics<parallel>], iteration_bounds = array<i64: 1>, scalar_prefetch = 0 : i64, scratch_operands = 0 : i64, tpu.core_type = #tpu.core_type<tc>, window_params = [{transform_indices = @transform_0, window_bounds = array<i64: 4, 512>}, {pipeline_mode = #tpu.pipeline_mode<synchronous>, transform_indices = @transform_1, window_bounds = array<i64: 11, 512>}, {pipeline_mode = #tpu.pipeline_mode<synchronous>, transform_indices = @transform_2, window_bounds = array<i64: 16, 31>}, {pipeline_mode = #tpu.pipeline_mode<synchronous>, transform_indices = @transform_3, window_bounds = array<i64: 4, 20>}, {pipeline_mode = #tpu.pipeline_mode<synchronous>, transform_indices = @transform_4, window_bounds = array<i64: 2, 5>}, {transform_indices = @transform_5, window_bounds = array<i64: 4, 512>}]} {
    %c0 = arith.constant 0 : index
    %c0_0 = arith.constant 0 : index
    %0 = vector.load %arg1[%c0, %c0_0] : memref<4x512xf32, #tpu.memory_space<vmem>>, vector<4x512xf32>
    %c0_1 = arith.constant 0 : index
    %c0_2 = arith.constant 0 : index
    %1 = vector.load %arg3[%c0_1, %c0_2] : memref<16x31xf32, #tpu.memory_space<vmem>>, vector<16x4xf32>
    %c0_3 = arith.constant 0 : index
    %c4 = arith.constant 4 : index
    %2 = vector.load %arg3[%c0_3, %c4] : memref<16x31xf32, #tpu.memory_space<vmem>>, vector<16x16xf32>
    %c0_4 = arith.constant 0 : index
    %c20 = arith.constant 20 : index
    %3 = vector.load %arg3[%c0_4, %c20] : memref<16x31xf32, #tpu.memory_space<vmem>>, vector<16x9xf32>
    %c0_5 = arith.constant 0 : index
    %c29 = arith.constant 29 : index
    %4 = vector.load %arg3[%c0_5, %c29] : memref<16x31xf32, #tpu.memory_space<vmem>>, vector<16x1xf32>
    %c0_6 = arith.constant 0 : index
    %c30 = arith.constant 30 : index
    %5 = vector.load %arg3[%c0_6, %c30] : memref<16x31xf32, #tpu.memory_space<vmem>>, vector<16x1xf32>
    %c0_7 = arith.constant 0 : index
    %c0_8 = arith.constant 0 : index
    %6 = vector.load %arg4[%c0_7, %c0_8] : memref<4x20xf32, #tpu.memory_space<vmem>>, vector<4x16xf32>
    %c0_9 = arith.constant 0 : index
    %c16 = arith.constant 16 : index
    %7 = vector.load %arg4[%c0_9, %c16] : memref<4x20xf32, #tpu.memory_space<vmem>>, vector<4x2xf32>
    %c0_10 = arith.constant 0 : index
    %c18 = arith.constant 18 : index
    %8 = vector.load %arg4[%c0_10, %c18] : memref<4x20xf32, #tpu.memory_space<vmem>>, vector<4x1xf32>
    %c0_11 = arith.constant 0 : index
    %c19 = arith.constant 19 : index
    %9 = vector.load %arg4[%c0_11, %c19] : memref<4x20xf32, #tpu.memory_space<vmem>>, vector<4x1xf32>
    %c0_12 = arith.constant 0 : index
    %c0_13 = arith.constant 0 : index
    %10 = vector.load %arg5[%c0_12, %c0_13] : memref<2x5xf32, #tpu.memory_space<vmem>>, vector<2x4xf32>
    %c0_14 = arith.constant 0 : index
    %c4_15 = arith.constant 4 : index
    %11 = vector.load %arg5[%c0_14, %c4_15] : memref<2x5xf32, #tpu.memory_space<vmem>>, vector<2x1xf32>
    %cst = arith.constant dense<0.000000e+00> : vector<16x512xf32>
    %12 = tpu.matmul %1, %0, %cst {dimension_numbers = #tpu.dot_dimension_numbers<[1], [0], [0], [1], [0, 0, 1, 1], [], []>} : vector<16x4xf32>, vector<4x512xf32>, vector<16x512xf32> -> vector<16x512xf32>
    %13 = vector.broadcast %4 : vector<16x1xf32> to vector<16x512xf32>
    %14 = arith.addf %12, %13 : vector<16x512xf32>
    %15 = arith.negf %14 : vector<16x512xf32>
    %16 = math.exp %15 : vector<16x512xf32>
    %cst_16 = arith.constant 1.000000e+00 : f32
    %17 = vector.broadcast %cst_16 : f32 to vector<16x512xf32>
    %18 = arith.addf %17, %16 : vector<16x512xf32>
    %19 = arith.divf %17, %18 : vector<16x512xf32>
    %20 = arith.mulf %14, %19 : vector<16x512xf32>
    %cst_17 = arith.constant 0.000000e+00 : f32
    %21 = vector.broadcast %cst_17 : f32 to vector<16x512xf32>
    %c17_i32 = arith.constant 17 : i32
    %22 = tpu.dynamic_rotate %20 by %c17_i32 dim 1 : vector<16x512xf32>, i32 -> vector<16x512xf32>
    %c2 = arith.constant 2 : index
    %c0_18 = arith.constant 0 : index
    %23 = vector.load %arg2[%c2, %c0_18] : memref<11x512xf32, #tpu.memory_space<vmem>>, vector<1x512xf32>
    %24 = vector.broadcast %23 : vector<1x512xf32> to vector<16x512xf32>
    %25 = arith.mulf %22, %24 : vector<16x512xf32>
    %26 = vector.extract_strided_slice %3 {offsets = [0, 0], sizes = [16, 1], strides = [1, 1]} : vector<16x9xf32> to vector<16x1xf32>
    %27 = vector.broadcast %26 : vector<16x1xf32> to vector<16x512xf32>
    %28 = arith.mulf %25, %27 : vector<16x512xf32>
    %29 = arith.addf %21, %28 : vector<16x512xf32>
    %c16_i32 = arith.constant 16 : i32
    %30 = tpu.dynamic_rotate %20 by %c16_i32 dim 1 : vector<16x512xf32>, i32 -> vector<16x512xf32>
    %c3 = arith.constant 3 : index
    %c0_19 = arith.constant 0 : index
    %31 = vector.load %arg2[%c3, %c0_19] : memref<11x512xf32, #tpu.memory_space<vmem>>, vector<1x512xf32>
    %32 = vector.broadcast %31 : vector<1x512xf32> to vector<16x512xf32>
    %33 = arith.mulf %30, %32 : vector<16x512xf32>
    %34 = vector.extract_strided_slice %3 {offsets = [0, 1], sizes = [16, 1], strides = [1, 1]} : vector<16x9xf32> to vector<16x1xf32>
    %35 = vector.broadcast %34 : vector<16x1xf32> to vector<16x512xf32>
    %36 = arith.mulf %33, %35 : vector<16x512xf32>
    %37 = arith.addf %29, %36 : vector<16x512xf32>
    %c15_i32 = arith.constant 15 : i32
    %38 = tpu.dynamic_rotate %20 by %c15_i32 dim 1 : vector<16x512xf32>, i32 -> vector<16x512xf32>
    %c4_20 = arith.constant 4 : index
    %c0_21 = arith.constant 0 : index
    %39 = vector.load %arg2[%c4_20, %c0_21] : memref<11x512xf32, #tpu.memory_space<vmem>>, vector<1x512xf32>
    %40 = vector.broadcast %39 : vector<1x512xf32> to vector<16x512xf32>
    %41 = arith.mulf %38, %40 : vector<16x512xf32>
    %42 = vector.extract_strided_slice %3 {offsets = [0, 2], sizes = [16, 1], strides = [1, 1]} : vector<16x9xf32> to vector<16x1xf32>
    %43 = vector.broadcast %42 : vector<16x1xf32> to vector<16x512xf32>
    %44 = arith.mulf %41, %43 : vector<16x512xf32>
    %45 = arith.addf %37, %44 : vector<16x512xf32>
    %c1_i32 = arith.constant 1 : i32
    %46 = tpu.dynamic_rotate %20 by %c1_i32 dim 1 : vector<16x512xf32>, i32 -> vector<16x512xf32>
    %c5 = arith.constant 5 : index
    %c0_22 = arith.constant 0 : index
    %47 = vector.load %arg2[%c5, %c0_22] : memref<11x512xf32, #tpu.memory_space<vmem>>, vector<1x512xf32>
    %48 = vector.broadcast %47 : vector<1x512xf32> to vector<16x512xf32>
    %49 = arith.mulf %46, %48 : vector<16x512xf32>
    %50 = vector.extract_strided_slice %3 {offsets = [0, 3], sizes = [16, 1], strides = [1, 1]} : vector<16x9xf32> to vector<16x1xf32>
    %51 = vector.broadcast %50 : vector<16x1xf32> to vector<16x512xf32>
    %52 = arith.mulf %49, %51 : vector<16x512xf32>
    %53 = arith.addf %45, %52 : vector<16x512xf32>
    %54 = vector.extract_strided_slice %3 {offsets = [0, 4], sizes = [16, 1], strides = [1, 1]} : vector<16x9xf32> to vector<16x1xf32>
    %55 = vector.broadcast %54 : vector<16x1xf32> to vector<16x512xf32>
    %56 = arith.mulf %20, %55 : vector<16x512xf32>
    %57 = arith.addf %53, %56 : vector<16x512xf32>
    %c511_i32 = arith.constant 511 : i32
    %58 = tpu.dynamic_rotate %20 by %c511_i32 dim 1 : vector<16x512xf32>, i32 -> vector<16x512xf32>
    %c7 = arith.constant 7 : index
    %c0_23 = arith.constant 0 : index
    %59 = vector.load %arg2[%c7, %c0_23] : memref<11x512xf32, #tpu.memory_space<vmem>>, vector<1x512xf32>
    %60 = vector.broadcast %59 : vector<1x512xf32> to vector<16x512xf32>
    %61 = arith.mulf %58, %60 : vector<16x512xf32>
    %62 = vector.extract_strided_slice %3 {offsets = [0, 5], sizes = [16, 1], strides = [1, 1]} : vector<16x9xf32> to vector<16x1xf32>
    %63 = vector.broadcast %62 : vector<16x1xf32> to vector<16x512xf32>
    %64 = arith.mulf %61, %63 : vector<16x512xf32>
    %65 = arith.addf %57, %64 : vector<16x512xf32>
    %c497_i32 = arith.constant 497 : i32
    %66 = tpu.dynamic_rotate %20 by %c497_i32 dim 1 : vector<16x512xf32>, i32 -> vector<16x512xf32>
    %c8 = arith.constant 8 : index
    %c0_24 = arith.constant 0 : index
    %67 = vector.load %arg2[%c8, %c0_24] : memref<11x512xf32, #tpu.memory_space<vmem>>, vector<1x512xf32>
    %68 = vector.broadcast %67 : vector<1x512xf32> to vector<16x512xf32>
    %69 = arith.mulf %66, %68 : vector<16x512xf32>
    %70 = vector.extract_strided_slice %3 {offsets = [0, 6], sizes = [16, 1], strides = [1, 1]} : vector<16x9xf32> to vector<16x1xf32>
    %71 = vector.broadcast %70 : vector<16x1xf32> to vector<16x512xf32>
    %72 = arith.mulf %69, %71 : vector<16x512xf32>
    %73 = arith.addf %65, %72 : vector<16x512xf32>
    %c496_i32 = arith.constant 496 : i32
    %74 = tpu.dynamic_rotate %20 by %c496_i32 dim 1 : vector<16x512xf32>, i32 -> vector<16x512xf32>
    %c9 = arith.constant 9 : index
    %c0_25 = arith.constant 0 : index
    %75 = vector.load %arg2[%c9, %c0_25] : memref<11x512xf32, #tpu.memory_space<vmem>>, vector<1x512xf32>
    %76 = vector.broadcast %75 : vector<1x512xf32> to vector<16x512xf32>
    %77 = arith.mulf %74, %76 : vector<16x512xf32>
    %78 = vector.extract_strided_slice %3 {offsets = [0, 7], sizes = [16, 1], strides = [1, 1]} : vector<16x9xf32> to vector<16x1xf32>
    %79 = vector.broadcast %78 : vector<16x1xf32> to vector<16x512xf32>
    %80 = arith.mulf %77, %79 : vector<16x512xf32>
    %81 = arith.addf %73, %80 : vector<16x512xf32>
    %c495_i32 = arith.constant 495 : i32
    %82 = tpu.dynamic_rotate %20 by %c495_i32 dim 1 : vector<16x512xf32>, i32 -> vector<16x512xf32>
    %c10 = arith.constant 10 : index
    %c0_26 = arith.constant 0 : index
    %83 = vector.load %arg2[%c10, %c0_26] : memref<11x512xf32, #tpu.memory_space<vmem>>, vector<1x512xf32>
    %84 = vector.broadcast %83 : vector<1x512xf32> to vector<16x512xf32>
    %85 = arith.mulf %82, %84 : vector<16x512xf32>
    %86 = vector.extract_strided_slice %3 {offsets = [0, 8], sizes = [16, 1], strides = [1, 1]} : vector<16x9xf32> to vector<16x1xf32>
    %87 = vector.broadcast %86 : vector<16x1xf32> to vector<16x512xf32>
    %88 = arith.mulf %85, %87 : vector<16x512xf32>
    %89 = arith.addf %81, %88 : vector<16x512xf32>
    %cst_27 = arith.constant dense<0.000000e+00> : vector<16x512xf32>
    %90 = tpu.matmul %2, %89, %cst_27 {dimension_numbers = #tpu.dot_dimension_numbers<[1], [0], [0], [1], [0, 0, 1, 1], [], []>} : vector<16x16xf32>, vector<16x512xf32>, vector<16x512xf32> -> vector<16x512xf32>
    %91 = vector.broadcast %5 : vector<16x1xf32> to vector<16x512xf32>
    %92 = arith.addf %90, %91 : vector<16x512xf32>
    %93 = arith.negf %92 : vector<16x512xf32>
    %94 = math.exp %93 : vector<16x512xf32>
    %cst_28 = arith.constant 1.000000e+00 : f32
    %95 = vector.broadcast %cst_28 : f32 to vector<16x512xf32>
    %96 = arith.addf %95, %94 : vector<16x512xf32>
    %97 = arith.divf %95, %96 : vector<16x512xf32>
    %98 = arith.mulf %92, %97 : vector<16x512xf32>
    %cst_29 = arith.constant dense<0.000000e+00> : vector<4x512xf32>
    %99 = tpu.matmul %6, %98, %cst_29 {dimension_numbers = #tpu.dot_dimension_numbers<[1], [0], [0], [1], [0, 0, 1, 1], [], []>} : vector<4x16xf32>, vector<16x512xf32>, vector<4x512xf32> -> vector<4x512xf32>
    %100 = vector.broadcast %8 : vector<4x1xf32> to vector<4x512xf32>
    %101 = arith.addf %99, %100 : vector<4x512xf32>
    %c0_30 = arith.constant 0 : index
    %c0_31 = arith.constant 0 : index
    %102 = vector.load %arg2[%c0_30, %c0_31] : memref<11x512xf32, #tpu.memory_space<vmem>>, vector<2x512xf32>
    %cst_32 = arith.constant dense<0.000000e+00> : vector<4x2xf32>
    %103 = tpu.matmul %101, %102, %cst_32 {dimension_numbers = #tpu.dot_dimension_numbers<[1], [1], [0], [0], [0, 0, 1, 0], [], []>} : vector<4x512xf32>, vector<2x512xf32>, vector<4x2xf32> -> vector<4x2xf32>
    %cst_33 = arith.constant dense<0.000000e+00> : vector<2x2xf32>
    %104 = tpu.matmul %10, %103, %cst_33 {dimension_numbers = #tpu.dot_dimension_numbers<[1], [0], [0], [1], [0, 0, 1, 1], [], []>} : vector<2x4xf32>, vector<4x2xf32>, vector<2x2xf32> -> vector<2x2xf32>
    %105 = vector.broadcast %11 : vector<2x1xf32> to vector<2x2xf32>
    %106 = arith.addf %104, %105 : vector<2x2xf32>
    %cst_34 = arith.constant 0.000000e+00 : f32
    %107 = vector.broadcast %cst_34 : f32 to vector<2x2xf32>
    %108 = arith.maximumf %106, %107 : vector<2x2xf32>
    %cst_35 = arith.constant dense<0.000000e+00> : vector<4x2xf32>
    %109 = tpu.matmul %7, %108, %cst_35 {dimension_numbers = #tpu.dot_dimension_numbers<[1], [0], [0], [1], [0, 0, 1, 1], [], []>} : vector<4x2xf32>, vector<2x2xf32>, vector<4x2xf32> -> vector<4x2xf32>
    %110 = vector.broadcast %9 : vector<4x1xf32> to vector<4x2xf32>
    %111 = arith.addf %109, %110 : vector<4x2xf32>
    %112 = arith.negf %111 : vector<4x2xf32>
    %113 = math.exp %112 : vector<4x2xf32>
    %cst_36 = arith.constant 1.000000e+00 : f32
    %114 = vector.broadcast %cst_36 : f32 to vector<4x2xf32>
    %115 = arith.addf %114, %113 : vector<4x2xf32>
    %116 = arith.divf %114, %115 : vector<4x2xf32>
    %cst_37 = arith.constant dense<0.000000e+00> : vector<4x512xf32>
    %117 = tpu.matmul %116, %102, %cst_37 {dimension_numbers = #tpu.dot_dimension_numbers<[1], [0], [0], [1], [0, 0, 1, 1], [], []>} : vector<4x2xf32>, vector<2x512xf32>, vector<4x512xf32> -> vector<4x512xf32>
    %118 = arith.mulf %101, %117 : vector<4x512xf32>
    %119 = arith.addf %118, %0 : vector<4x512xf32>
    %c0_38 = arith.constant 0 : index
    %c0_39 = arith.constant 0 : index
    %120 = vector.load %arg6[%c0_38, %c0_39] : memref<4x512xf32, #tpu.memory_space<vmem>>, vector<4x512xf32>
    tpu.vector_store %arg6[%c0_38, %c0_39], %119 {strides = array<i32>} : memref<4x512xf32, #tpu.memory_space<vmem>>, vector<4x512xf32>,
    return
  }
  func.func @transform_0(%arg0: i32) -> (i32, i32) {
    %c0_i32 = arith.constant 0 : i32
    %c0_i32_0 = arith.constant 0 : i32
    return %c0_i32, %arg0 : i32, i32
  }
  func.func @transform_1(%arg0: i32) -> (i32, i32) {
    %c0_i32 = arith.constant 0 : i32
    %c0_i32_0 = arith.constant 0 : i32
    %c0_i32_1 = arith.constant 0 : i32
    return %c0_i32, %c0_i32_0 : i32, i32
  }
  func.func @transform_2(%arg0: i32) -> (i32, i32) {
    %c0_i32 = arith.constant 0 : i32
    %c0_i32_0 = arith.constant 0 : i32
    %c0_i32_1 = arith.constant 0 : i32
    return %c0_i32, %c0_i32_0 : i32, i32
  }
  func.func @transform_3(%arg0: i32) -> (i32, i32) {
    %c0_i32 = arith.constant 0 : i32
    %c0_i32_0 = arith.constant 0 : i32
    %c0_i32_1 = arith.constant 0 : i32
    return %c0_i32, %c0_i32_0 : i32, i32
  }
  func.func @transform_4(%arg0: i32) -> (i32, i32) {
    %c0_i32 = arith.constant 0 : i32
    %c0_i32_0 = arith.constant 0 : i32
    %c0_i32_1 = arith.constant 0 : i32
    return %c0_i32, %c0_i32_0 : i32, i32
  }
  func.func @transform_5(%arg0: i32) -> (i32, i32) {
    %c0_i32 = arith.constant 0 : i32
    %c0_i32_0 = arith.constant 0 : i32
    return %c0_i32, %arg0 : i32, i32
  }
}

</mosaic_0001>

<bundles_post_ra>
// kernel: tpu_custom_call.1
= control target key start
LH: loop header
LB: loop body
LE: loop exit
PB: predicated region body
PF: predicated region fallthrough
CT: control target
= control target key end

     0   :  { %10 = vsyncpa [#allocation3], 0  ;;  %s3095_s0 = inlined_call_operand.hbm [shape: f32[4,512], index: 0, kind: input, shape index: {}]   ;;  %s3096_s1 = inlined_call_operand.hbm [shape: f32[11,512], index: 1, kind: input, shape index: {}]   ;;  %s3097_s2 = inlined_call_operand.hbm [shape: f32[16,31], index: 2, kind: input, shape index: {}]   ;;  %s3098_s3 = inlined_call_operand.vmem [shape: f32[4,20], index: 3, kind: input, shape index: {}]   ;;  %s3099_s4 = inlined_call_operand.vmem [shape: f32[2,5], index: 4, kind: input, shape index: {}]   ;;  %s3100_s5 = inlined_call_operand.hbm [shape: f32[4,512], index: 5, kind: output, shape index: {}]  }
   0x1   :  { %11 = vsyncpa [#allocation6], 0 }
   0x2   :  { %12 = vsyncpa [#allocation4], 0  ;;  %s2149_s18 = smov [#allocation5]   ;;  %s2055_s22 = scalar_lea.hbm %s3096_s1, 1024 }
   0x3   :  { %s28_s19 = sshll.u32 %s2149_s18, 4  ;;  %p2056_p0 = scmp.ne.s32.totalorder %s3096_s1, %s2055_s22  ;;  %s29_s19 = int_to_ptr.vmem [resolvable:$true] %s28_s19 }
   0x4   :  { %p2059_p1 = scmp.lt.u32.totalorder %s2055_s22, %s3096_s1 }
   0x6   :  { %p2061_p2 = pnand %p2059_p1, %p2056_p0 }
   0x8   :  { %2064 = shalt.err (!%p2061_p2)
}
   0x9   :  { %s2065_s27 = scalar_lea.vmem %s29_s19, 1024  ;;  %p2070_p4 = scmp.lt.s32.totalorder %s29_s19, %s29_s19 }
   0xa   :  { %p2066_p3 = scmp.ne.s32.totalorder %s29_s19, %s2065_s27  ;;  %p2071_p5 = scmp.lt.s32.totalorder %s2065_s27, %s2065_s27 }
   0xc   :  { %p2072_p6 = por %p2071_p5, %p2070_p4 }
   0xe   :  { %p2073_p7 = pnand %p2072_p6, %p2066_p3 }
  0x10   :  { %2076 = shalt.err (!%p2073_p7)
}
  0x11   :  { %s2150_s28 = smov 512   ;;  %s2151_s29 = smov 32  }
  0x12   :  { %34 = dma.hbm_to_vmem [thread:$0]  %s3096_s1, 1024, %s29_s19, [#allocation6], %s2150_s28, %s2150_s28, %s2151_s29  }
  0x13   :  { %s2152_s7 = smov [#allocation2]   ;;  %s2153_s9 = smov [#allocation7]  }
  0x14   :  { %s19_s8 = sshll.u32 %s2152_s7, 4  ;;  %s40_s10 = sshll.u32 %s2153_s9, 4  ;;  %s20_s8 = int_to_ptr.vmem [resolvable:$true] %s19_s8  ;;  %s41_s10 = int_to_ptr.vmem [resolvable:$true] %s40_s10 }
  0x15   :  { %s2077_s13 = scalar_lea.hbm %s3095_s0, 256 }
  0x16   :  { %p2078_p8 = scmp.ne.s32.totalorder %s3095_s0, %s2077_s13  ;;  %p2081_p9 = scmp.lt.u32.totalorder %s2077_s13, %s3095_s0 }
  0x18   :  { %p2083_p10 = pnand %p2081_p9, %p2078_p8 }
  0x1a   :  { %2086 = shalt.err (!%p2083_p10)
}
  0x1b   :  { %s2087_s1 = scalar_lea.vmem %s20_s8, 256  ;;  %p2092_p12 = scmp.lt.s32.totalorder %s20_s8, %s20_s8 }
  0x1c   :  { %p2088_p11 = scmp.ne.s32.totalorder %s20_s8, %s2087_s1  ;;  %p2093_p13 = scmp.lt.s32.totalorder %s2087_s1, %s2087_s1 }
  0x1e   :  { %p2094_p0 = por %p2093_p13, %p2092_p12 }
  0x20   :  { %p2095_p1 = pnand %p2094_p0, %p2088_p11 }
  0x22   :  { %2098 = shalt.err (!%p2095_p1)
}
  0x23   :  { %22 = dma.hbm_to_vmem [thread:$0]  %s3095_s0, 256, %s20_s8, [#allocation3]  }
  0x24   :  { %s2099_s22 = scalar_lea.hbm %s3097_s2, 256 }
  0x25   :  { %p2100_p2 = scmp.ne.s32.totalorder %s3097_s2, %s2099_s22  ;;  %p2103_p3 = scmp.lt.u32.totalorder %s2099_s22, %s3097_s2 }
  0x27   :  { %p2105_p4 = pnand %p2103_p3, %p2100_p2 }
  0x29   :  { %2108 = shalt.err (!%p2105_p4)
}
  0x2a   :  { %s2109_s27 = scalar_lea.vmem %s41_s10, 256  ;;  %p2114_p6 = scmp.lt.s32.totalorder %s41_s10, %s41_s10 }
  0x2b   :  { %p2110_p5 = scmp.ne.s32.totalorder %s41_s10, %s2109_s27  ;;  %p2115_p7 = scmp.lt.s32.totalorder %s2109_s27, %s2109_s27 }
  0x2d   :  { %p2116_p8 = por %p2115_p7, %p2114_p6 }
  0x2f   :  { %p2117_p9 = pnand %p2116_p8, %p2110_p5 }
  0x31   :  { %2120 = shalt.err (!%p2117_p9)
}
  0x32   :  { %s2154_s0 = smov 128   ;;  %s2155_s28 = smov 8  }
  0x33   :  { %46 = dma.hbm_to_vmem [thread:$0]  %s3097_s2, 256, %s41_s10, [#allocation6], %s2154_s0, %s2154_s0, %s2155_s28  }
  0x34   :  { %2143 = dma.done.wait [#allocation3], 256  }
  0x35   :  { %2144 = vsyncadd [#allocation3], 4294967040 }
  0x36   :  { %2145 = dma.done.wait [#allocation6], 1280  }
  0x37   :  { %2146 = vsyncadd [#allocation6], 4294966016  ;;  %v3101_v0 = vmov 0.0   ;;  %v2157_v1 = vmov 29   ;;  %v2158_v2 = vmov 20   ;;  %v60_v3 = vld [vmem:[#allocation2] sm:$0xff] }
  0x38   :  { %158 = vmatprep.mubr.f32.mxu0 %v3101_v0  ;;  %235 = vmatprep.mubr.f32.mxu1 %v3101_v0  ;;  %vm85_vm0 = vcmask 1043456   ;;  %v61_v4 = vld [vmem:[#allocation2 + $0x8] sm:$0xff]  ;;  %v2250_v5 = vld [vmem:[#allocation7] sm:$0xff]  ;;  %v2252_v6 = vcombine.high %v60_v3, %v60_v3  ;;  %vm80_vm1 = vcmask 31744   ;;  %v2270_v8 = vld [vmem:[#allocation7 + $0x8] sm:$0xff]  ;;  %v2159_v9 = vmov 21  }
  0x39   :  { %1959 = vset.pattern.permute.xlu0 %v2157_v1  ;;  %1960 = vset.pattern.permute.xlu1 %v2158_v2  ;;  %v2254_v7 = vcombine.high %v61_v4, %v61_v4  ;;  %v2160_v10 = vmov 22   ;;  %v2161_v11 = vmov 23   ;;  %v2162_v12 = vmov 24   ;;  %s2167_s2 = smov 16   ;;  %s2168_s6 = smov 17  }
  0x3a   :  { %3152 = vst [vmem:[#allocation12_spill] sm:$0xff] %v2252_v6  ;;  %68 = vperm.xlu0 %1959, %v2250_v5   ;;  %363 = vperm.xlu1 %1960, %v2250_v5   ;;  %v2163_v13 = vmov 25   ;;  %v2164_v14 = vmov 26   ;;  %v2165_v15 = vmov 27   ;;  %v2166_v16 = vmov 28   ;;  %s2169_s7 = smov 1  }
  0x3b   :  { %3153 = vst [vmem:[#allocation13_spill] sm:$0xff] %v2254_v7  ;;  %1853 = vmatprep.subr.msk.mxu0 %vm85_vm0, %v2252_v6  ;;  %1857 = vmatprep.subr.msk.mxu1 %vm85_vm0, %v2254_v7  ;;  %s2170_s8 = smov 15   ;;  %s2171_s9 = smov 127   ;;  %vm982_vm10 = vcmask 130048   ;;  %vm2178_vm11 = vmmov 0   ;;  %vm1580_vm12 = vcmask 1041408  }
  0x3c   :  { %1854 = vmatpush1.msk.msra.mxu0 %vm85_vm0, %v60_v3  ;;  %1858 = vmatpush1.msk.msra.mxu1 %vm85_vm0, %v61_v4  ;;  %s2172_s10 = smov 112   ;;  %s2173_s11 = smov 113   ;;  %vm1577_vm13 = vcmask 15360  }
  0x3d   :  { %1855 = vmatmul.mubr.msk.f32.vlgmr.msra.gmra.mrb[0].mxu0 %vm80_vm1, %v2250_v5  ;;  %1859 = vmatmul.mubr.msk.f32.vlgmr.msra.gmra.mrb[0].mxu1 %vm80_vm1, %v2250_v5  ;;  %s2174_s12 = smov 111   ;;  %s2175_s13 = smov 124  }
  0x3e   :  { %164 = vmatprep.mubr.f32.mxu0 %v3101_v0  ;;  %241 = vmatprep.mubr.f32.mxu1 %v3101_v0 }
  0x3f   :  { %73 = vperm.xlu0 %1959, %v2270_v8   ;;  %367 = vperm.xlu1 %1960, %v2270_v8  }
  0x41   :  { %1856 = vmatmul.mubr.msk.f32.gmra.mrb[2].mxu0 %vm80_vm1, %v2270_v8  ;;  %1860 = vmatmul.mubr.msk.f32.gmra.mrb[2].mxu1 %vm80_vm1, %v2270_v8 }
  0x42   :  { %1051 = vmatprep.mubr.f32.mxu0 %v3101_v0  ;;  %1128 = vmatprep.mubr.f32.mxu1 %v3101_v0 }
  0x43   :  { %1962 = vset.pattern.permute.xlu1 %v2159_v9  ;;  %1961 = vset.pattern.permute.xlu0 %v2159_v9 }
  0x44   :  { %447 = vperm.xlu1 %1962, %v2270_v8   ;;  %443 = vperm.xlu0 %1961, %v2250_v5  }
  0x48   :  { %1963 = vset.pattern.permute.xlu1 %v2160_v10  ;;  %1964 = vset.pattern.permute.xlu0 %v2160_v10 }
  0x49   :  { %523 = vperm.xlu1 %1963, %v2250_v5   ;;  %527 = vperm.xlu0 %1964, %v2270_v8  }
  0x4d   :  { %1966 = vset.pattern.permute.xlu1 %v2161_v11  ;;  %1965 = vset.pattern.permute.xlu0 %v2161_v11 }
  0x4e   :  { %607 = vperm.xlu1 %1966, %v2270_v8   ;;  %603 = vperm.xlu0 %1965, %v2250_v5  }
  0x52   :  { %1967 = vset.pattern.permute.xlu1 %v2162_v12  ;;  %1968 = vset.pattern.permute.xlu0 %v2162_v12 }
  0x53   :  { %627 = vperm.xlu1 %1967, %v2250_v5   ;;  %631 = vperm.xlu0 %1968, %v2270_v8  }
  0x57   :  { %1970 = vset.pattern.permute.xlu1 %v2163_v13  ;;  %1969 = vset.pattern.permute.xlu0 %v2163_v13 }
  0x58   :  { %711 = vperm.xlu1 %1970, %v2270_v8   ;;  %707 = vperm.xlu0 %1969, %v2250_v5  }
  0x5c   :  { %1971 = vset.pattern.permute.xlu1 %v2164_v14  ;;  %1972 = vset.pattern.permute.xlu0 %v2164_v14 }
  0x5d   :  { %787 = vperm.xlu1 %1971, %v2250_v5   ;;  %791 = vperm.xlu0 %1972, %v2270_v8  }
  0x61   :  { %1974 = vset.pattern.permute.xlu1 %v2165_v15  ;;  %1973 = vset.pattern.permute.xlu0 %v2165_v15 }
  0x62   :  { %871 = vperm.xlu1 %1974, %v2270_v8   ;;  %867 = vperm.xlu0 %1973, %v2250_v5  }
  0x66   :  { %1975 = vset.pattern.permute.xlu1 %v2166_v16  ;;  %1976 = vset.pattern.permute.xlu0 %v2166_v16 }
  0x67   :  { %947 = vperm.xlu1 %1975, %v2250_v5   ;;  %951 = vperm.xlu0 %1976, %v2270_v8  }
  0xb9   :  { %v2296_v17 = vpop.permute.xlu1 %363  ;;  %v69_v18 = vpop.permute.xlu0 %68 }
  0xbe   :  { %v2298_v28 = vpop.permute.xlu1 %367  ;;  %v74_v57 = vpop.permute.xlu0 %73 }
  0xbf   :  { %3154 = vst [vmem:[#allocation14_spill] sm:$0xff] %v2298_v28 }
  0xc3   :  { %v2304_v34 = vpop.permute.xlu1 %447 }
  0xc4   :  { %3155 = vst [vmem:[#allocation15_spill] sm:$0xff] %v2304_v34 }
  0xc8   :  { %v2306_v38 = vpop.permute.xlu1 %523 }
  0xcd   :  { %v2308_v43 = vpop.permute.xlu1 %607 }
  0xce   :  { %3156 = vst [vmem:[#allocation16_spill] sm:$0xff] %v2308_v43 }
  0xd2   :  { %v2310_v46 = vpop.permute.xlu1 %627 }
 0x110   :  { %v160_v19 = vpop.f32.mrb[0].mxu0  ;;  %v237_v20 = vpop.f32.mrb[0].mxu1 }
 0x111   :  { %v161_v21 = vadd.f32 %v160_v19, %v69_v18  ;;  %v238_v22 = vadd.f32 %v237_v20, %v69_v18  ;;  %v162_v23 = vpop.f32.mrb[1].mxu0  ;;  %v239_v24 = vpop.f32.mrb[1].mxu1 }
 0x112   :  { %v163_v25 = vadd.f32 %v162_v23, %v69_v18  ;;  %v240_v42 = vadd.f32 %v239_v24, %v69_v18 }
 0x113   :  { %v1861_v26 = vmul.f32 -1.442695, %v161_v21  ;;  %v1863_v27 = vmul.f32 -1.442695, %v238_v22 }
 0x114   :  { %v1862_v29 = vmul.f32 -1.442695, %v163_v25  ;;  %v166_v30 = vpop.f32.mrb[2].mxu0  ;;  %v243_v31 = vpop.f32.mrb[2].mxu1  ;;  %v1864_v44 = vmul.f32 -1.442695, %v240_v42 }
 0x115   :  { %1985 = vpow2.f32 %v1861_v26  ;;  %v2300_v32 = vpop.f32.mrb[3].mxu0  ;;  %v2302_v33 = vpop.f32.mrb[3].mxu1  ;;  %v167_v58 = vadd.f32 %v166_v30, %v74_v57  ;;  %v244_v61 = vadd.f32 %v243_v31, %v74_v57 }
 0x116   :  { %1987 = vpow2.f32 %v1863_v27  ;;  %v246_v3 = vadd.f32 %v2302_v33, %v74_v57  ;;  %v169_v10 = vadd.f32 %v2300_v32, %v74_v57  ;;  %v2420_v31 = vpop.permute.xlu1 %711 }
 0x117   :  { %1989 = vpow2.f32 %v1862_v29  ;;  %v1865_v59 = vmul.f32 -1.442695, %v167_v58  ;;  %v1867_v63 = vmul.f32 -1.442695, %v244_v61  ;;  %3158 = vst [vmem:[#allocation18_spill] sm:$0xff] %v2420_v31 }
 0x118   :  { %v1868_v4 = vmul.f32 -1.442695, %v246_v3  ;;  %v1866_v13 = vmul.f32 -1.442695, %v169_v10 }
 0x11a   :  { %v2432_v33 = vpop.permute.xlu1 %787 }
 0x11b   :  { %3160 = vst [vmem:[#allocation20_spill] sm:$0xff] %v2432_v33 }
 0x11f   :  { %v1986_v35 = vpop.eup %1985 }
 0x120   :  { %v1988_v36 = vpop.eup %1987  ;;  %v272_v37 = vadd.f32 1.0, %v1986_v35 }
 0x121   :  { %v1990_v39 = vpop.eup %1989  ;;  %v274_v40 = vadd.f32 1.0, %v1988_v36  ;;  %v2440_v36 = vpop.permute.xlu1 %871 }
 0x122   :  { %1991 = vrcp.f32 %v272_v37  ;;  %v273_v41 = vadd.f32 1.0, %v1990_v39  ;;  %3162 = vst [vmem:[#allocation22_spill] sm:$0xff] %v2440_v36  ;;  %v572_v36 = vld [vmem:[#allocation5 + $0x5] ss:$8 sm:$0xf] }
 0x123   :  { %1993 = vrcp.f32 %v274_v40 }
 0x124   :  { %1995 = vrcp.f32 %v273_v41 }
 0x125   :  { %1997 = vpow2.f32 %v1864_v44  ;;  %v2452_v39 = vpop.permute.xlu1 %947 }
 0x126   :  { %3164 = vst [vmem:[#allocation24_spill] sm:$0xff] %v2452_v39 }
 0x12c   :  { %v1992_v45 = vpop.eup %1991 }
 0x12d   :  { %v1994_v47 = vpop.eup %1993  ;;  %v296_v48 = vmul.f32 %v1992_v45, %v161_v21 }
 0x12e   :  { %v1996_v49 = vpop.eup %1995  ;;  %v298_v50 = vmul.f32 %v1994_v47, %v238_v22  ;;  %v2384_v22 = vpop.permute.xlu0 %443 }
 0x12f   :  { %v2312_v51 = vmul.f32 %v1996_v49, %v163_v25  ;;  %v2315_v52 = vmul.f32 %v2310_v46, %v296_v48  ;;  %386 = vrot.lane.b32.xlu0 %v296_v48, %s2167_s2  ;;  %304 = vrot.lane.b32.xlu1 %v296_v48, %s2168_s6  ;;  %v1998_v55 = vpop.eup %1997 }
 0x130   :  { %v2320_v53 = vmul.f32 %v2310_v46, %v298_v50  ;;  %v275_v56 = vadd.f32 1.0, %v1998_v55 }
 0x131   :  { %v2324_v54 = vmul.f32 %v2310_v46, %v2312_v51 }
 0x132   :  { %1999 = vrcp.f32 %v275_v56  ;;  %v2396_v25 = vpop.permute.xlu0 %527  ;;  %v320_v56 = vlaneseq }
 0x133   :  { %546 = vrot.lane.b32.xlu0 %v296_v48, %s2169_s7  ;;  %466 = vrot.lane.b32.xlu1 %v296_v48, %s2170_s8  ;;  %2001 = vpow2.f32 %v1865_v59  ;;  %3157 = vst [vmem:[#allocation17_spill] sm:$0xff] %v2396_v25 }
 0x134   :  { %2003 = vpow2.f32 %v1867_v63  ;;  %v335_v59 = vshrl.u32 %v320_v56, 7 }
 0x136   :  { %v2402_v27 = vpop.permute.xlu0 %603 }
 0x137   :  { %394 = vrot.lane.b32.xlu0 %v298_v50, %s2167_s2  ;;  %312 = vrot.lane.b32.xlu1 %v298_v50, %s2168_s6 }
 0x13a   :  { %v2414_v30 = vpop.permute.xlu0 %631 }
 0x13b   :  { %658 = vrot.lane.b32.xlu0 %v298_v50, %s2171_s9  ;;  %650 = vrot.lane.b32.xlu1 %v296_v48, %s2171_s9 }
 0x13c   :  { %v2000_v60 = vpop.eup %1999 }
 0x13d   :  { %v2338_v62 = vmul.f32 %v2000_v60, %v240_v42  ;;  %v2002_v1 = vpop.eup %2001  ;;  %v2496_v60 = vand.u32 127, %v320_v56 }
 0x13e   :  { %v276_v2 = vadd.f32 1.0, %v2002_v1  ;;  %v2004_v9 = vpop.eup %2003  ;;  %v2422_v32 = vpop.permute.xlu0 %707  ;;  %v2502_v1 = vsub.s32 0, %v335_v59 }
 0x13f   :  { %554 = vrot.lane.b32.xlu0 %v298_v50, %s2169_s7  ;;  %474 = vrot.lane.b32.xlu1 %v298_v50, %s2170_s8  ;;  %v278_v11 = vadd.f32 1.0, %v2004_v9  ;;  %3159 = vst [vmem:[#allocation19_spill] sm:$0xff] %v2422_v32  ;;  %vm322_vm2 = vcmp.lt.s32.totalorder %v2496_v60, 17  ;;  %v2509_v9 = vsub.s32 1, %v335_v59  ;;  %vm402_vm3 = vcmp.lt.s32.totalorder %v2496_v60, 16 }
 0x140   :  { %2005 = vrcp.f32 %v276_v2  ;;  %v2504_v2 = vsub.s32 3, %v335_v59  ;;  %vm482_vm4 = vcmp.lt.s32.totalorder %v2496_v60, 15  ;;  %vm562_vm5 = vcmp.lt.s32.totalorder %v2496_v60, 1 }
 0x141   :  { %2007 = vpow2.f32 %v1868_v4  ;;  %v412_v4 = vld [vmem:[#allocation5 + $0x3] ss:$8 sm:$0xf]  ;;  %v2577_v25 = vrot.slane %v572_v36, %v2509_v9  ;;  %vm666_vm6 = vcmp.lt.s32.totalorder %v2496_v60, 127  ;;  %vm746_vm7 = vcmp.lt.s32.totalorder %v2496_v60, 113 }
 0x142   :  { %2009 = vrcp.f32 %v278_v11  ;;  %v2434_v35 = vpop.permute.xlu0 %791  ;;  %vm826_vm8 = vcmp.lt.s32.totalorder %v2496_v60, 112  ;;  %vm906_vm9 = vcmp.lt.s32.totalorder %v2496_v60, 111 }
 0x143   :  { %818 = vrot.lane.b32.xlu0 %v298_v50, %s2172_s10  ;;  %738 = vrot.lane.b32.xlu1 %v298_v50, %s2173_s11  ;;  %2011 = vpow2.f32 %v1866_v13  ;;  %3161 = vst [vmem:[#allocation21_spill] sm:$0xff] %v2434_v35 }
 0x146   :  { %v2442_v37 = vpop.permute.xlu0 %867 }
 0x147   :  { %810 = vrot.lane.b32.xlu0 %v296_v48, %s2172_s10  ;;  %730 = vrot.lane.b32.xlu1 %v296_v48, %s2173_s11  ;;  %3163 = vst [vmem:[#allocation23_spill] sm:$0xff] %v2442_v37  ;;  %v2601_v37 = vrot.slane %v572_v36, %v2502_v1 }
 0x14a   :  { %v2006_v12 = vpop.eup %2005  ;;  %v2454_v40 = vpop.permute.xlu0 %951 }
 0x14b   :  { %898 = vrot.lane.b32.xlu0 %v298_v50, %s2174_s12  ;;  %316 = vrot.lane.b32.xlu1 %v2338_v62, %s2168_s6  ;;  %v2364_v14 = vmul.f32 %v2006_v12, %v167_v58  ;;  %v2008_v15 = vpop.eup %2007  ;;  %3165 = vst [vmem:[#allocation25_spill] sm:$0xff] %v2454_v40 }
 0x14c   :  { %v279_v16 = vadd.f32 1.0, %v2008_v15  ;;  %v2010_v18 = vpop.eup %2009 }
 0x14d   :  { %v2012_v19 = vpop.eup %2011  ;;  %v2378_v20 = vmul.f32 %v2010_v18, %v244_v61 }
 0x14e   :  { %2013 = vrcp.f32 %v279_v16  ;;  %v277_v21 = vadd.f32 1.0, %v2012_v19  ;;  %v492_v19 = vld [vmem:[#allocation5 + $0x4] ss:$8 sm:$0xf] }
 0x14f   :  { %890 = vrot.lane.b32.xlu0 %v296_v48, %s2174_s12  ;;  %398 = vrot.lane.b32.xlu1 %v2338_v62, %s2167_s2  ;;  %v2548_v40 = vrot.slane %v492_v19, %v2509_v9  ;;  %v2569_v43 = vrot.slane %v492_v19, %v2502_v1 }
 0x150   :  { %2015 = vrcp.f32 %v277_v21  ;;  %v2531_v21 = vrot.slane %v412_v4, %v2502_v1 }
 0x151   :  { %3178 = vst [vmem:[#allocation38_spill] sm:$0xff] %v2548_v40 }
 0x152   :  { %3173 = vst [vmem:[#allocation33_spill] sm:$0xff] %v2531_v21 }
 0x153   :  { %308 = vrot.lane.b32.xlu0 %v2312_v51, %s2168_s6  ;;  %470 = vrot.lane.b32.xlu1 %v2312_v51, %s2170_s8 }
 0x157   :  { %390 = vrot.lane.b32.xlu0 %v2312_v51, %s2167_s2  ;;  %478 = vrot.lane.b32.xlu1 %v2338_v62, %s2170_s8 }
 0x158   :  { %v2014_v23 = vpop.eup %2013 }
 0x159   :  { %v2394_v24 = vmul.f32 %v2014_v23, %v246_v3  ;;  %v332_v3 = vld [vmem:[#allocation5 + $0x2] ss:$8 sm:$0xf]  ;;  %v2534_v23 = vrot.slane %v412_v4, %v2504_v2 }
 0x15a   :  { %v2016_v26 = vpop.eup %2015  ;;  %v2516_v12 = vrot.slane %v332_v3, %v2502_v1  ;;  %v2519_v13 = vrot.slane %v332_v3, %v2504_v2 }
 0x15b   :  { %550 = vrot.lane.b32.xlu0 %v2312_v51, %s2169_s7  ;;  %558 = vrot.lane.b32.xlu1 %v2338_v62, %s2169_s7  ;;  %v2408_v29 = vmul.f32 %v2016_v26, %v169_v10  ;;  %v2511_v10 = vsub.s32 2, %v335_v59  ;;  %3174 = vst [vmem:[#allocation34_spill] sm:$0xff] %v2534_v23  ;;  %v2537_v26 = vrot.slane %v332_v3, %v2509_v9  ;;  %v2176_v59 = vmov 30  }
 0x15c   :  { %3171 = vst [vmem:[#allocation31_spill] sm:$0xff] %v2516_v12  ;;  %3172 = vst [vmem:[#allocation32_spill] sm:$0xff] %v2519_v13  ;;  %1977 = vset.pattern.permute.xlu0 %v2176_v59  ;;  %1978 = vset.pattern.permute.xlu1 %v2176_v59  ;;  %v2561_v59 = vrot.slane %v412_v4, %v2509_v9 }
 0x15d   :  { %3175 = vst [vmem:[#allocation35_spill] sm:$0xff] %v2537_v26  ;;  %v2540_v56 = vrot.slane %v332_v3, %v2511_v10 }
 0x15e   :  { %3180 = vst [vmem:[#allocation40_spill] sm:$0xff] %v2561_v59 }
 0x15f   :  { %654 = vrot.lane.b32.xlu0 %v2312_v51, %s2171_s9  ;;  %734 = vrot.lane.b32.xlu1 %v2312_v51, %s2173_s11  ;;  %3176 = vst [vmem:[#allocation36_spill] sm:$0xff] %v2540_v56 }
 0x163   :  { %814 = vrot.lane.b32.xlu0 %v2312_v51, %s2172_s10  ;;  %306 = vrot.lane.b32.xlu1 %v2364_v14, %s2168_s6 }
 0x167   :  { %894 = vrot.lane.b32.xlu0 %v2312_v51, %s2174_s12  ;;  %388 = vrot.lane.b32.xlu1 %v2364_v14, %s2167_s2 }
 0x16b   :  { %468 = vrot.lane.b32.xlu0 %v2364_v14, %s2170_s8  ;;  %548 = vrot.lane.b32.xlu1 %v2364_v14, %s2169_s7 }
 0x16f   :  { %652 = vrot.lane.b32.xlu0 %v2364_v14, %s2171_s9  ;;  %314 = vrot.lane.b32.xlu1 %v2378_v20, %s2168_s6 }
 0x173   :  { %476 = vrot.lane.b32.xlu0 %v2378_v20, %s2170_s8  ;;  %396 = vrot.lane.b32.xlu1 %v2378_v20, %s2167_s2 }
 0x177   :  { %740 = vrot.lane.b32.xlu0 %v2378_v20, %s2173_s11  ;;  %660 = vrot.lane.b32.xlu1 %v2378_v20, %s2171_s9 }
 0x17b   :  { %318 = vrot.lane.b32.xlu0 %v2394_v24, %s2168_s6  ;;  %732 = vrot.lane.b32.xlu1 %v2364_v14, %s2173_s11 }
 0x17f   :  { %400 = vrot.lane.b32.xlu0 %v2394_v24, %s2167_s2  ;;  %556 = vrot.lane.b32.xlu1 %v2378_v20, %s2169_s7 }
 0x183   :  { %472 = vrot.lane.b32.xlu0 %v2408_v29, %s2170_s8  ;;  %820 = vrot.lane.b32.xlu1 %v2378_v20, %s2172_s10 }
 0x187   :  { %560 = vrot.lane.b32.xlu0 %v2394_v24, %s2169_s7  ;;  %812 = vrot.lane.b32.xlu1 %v2364_v14, %s2172_s10 }
 0x18b   :  { %662 = vrot.lane.b32.xlu0 %v2338_v62, %s2171_s9  ;;  %900 = vrot.lane.b32.xlu1 %v2378_v20, %s2174_s12 }
 0x18f   :  { %736 = vrot.lane.b32.xlu0 %v2408_v29, %s2173_s11  ;;  %892 = vrot.lane.b32.xlu1 %v2364_v14, %s2174_s12 }
 0x193   :  { %742 = vrot.lane.b32.xlu0 %v2338_v62, %s2173_s11  ;;  %310 = vrot.lane.b32.xlu1 %v2408_v29, %s2168_s6 }
 0x197   :  { %822 = vrot.lane.b32.xlu0 %v2338_v62, %s2172_s10  ;;  %392 = vrot.lane.b32.xlu1 %v2408_v29, %s2167_s2 }
 0x19b   :  { %902 = vrot.lane.b32.xlu0 %v2338_v62, %s2174_s12  ;;  %480 = vrot.lane.b32.xlu1 %v2394_v24, %s2170_s8 }
 0x19f   :  { %552 = vrot.lane.b32.xlu1 %v2408_v29, %s2169_s7  ;;  %978 = vrot.lane.b32.xlu0 %v2250_v5, %s2175_s13 }
 0x1a1   :  { %v2460_v41 = vpop.permute.xlu0 %386  ;;  %v2462_v42 = vpop.permute.xlu1 %304 }
 0x1a3   :  { %656 = vrot.lane.b32.xlu1 %v2408_v29, %s2171_s9  ;;  %971 = vperm.xlu0 %1977, %v2250_v5   ;;  %v2566_v5 = vrot.slane %v412_v4, %v2511_v10 }
 0x1a5   :  { %v2466_v44 = vpop.permute.xlu0 %546  ;;  %v2468_v45 = vpop.permute.xlu1 %466  ;;  %3181 = vst [vmem:[#allocation41_spill] sm:$0xff] %v2566_v5 }
 0x1a7   :  { %816 = vrot.lane.b32.xlu1 %v2408_v29, %s2172_s10 }
 0x1a9   :  { %v2472_v47 = vpop.permute.xlu0 %394  ;;  %v2474_v48 = vpop.permute.xlu1 %312 }
 0x1ab   :  { %896 = vrot.lane.b32.xlu1 %v2408_v29, %s2174_s12 }
 0x1ad   :  { %v2478_v49 = vpop.permute.xlu0 %658  ;;  %v2480_v50 = vpop.permute.xlu1 %650 }
 0x1af   :  { %664 = vrot.lane.b32.xlu1 %v2394_v24, %s2171_s9 }
 0x1b1   :  { %v2484_v51 = vpop.permute.xlu0 %554  ;;  %v2486_v55 = vpop.permute.xlu1 %474 }
 0x1b3   :  { %744 = vrot.lane.b32.xlu1 %v2394_v24, %s2173_s11 }
 0x1b5   :  { %v2490_v57 = vpop.permute.xlu0 %818  ;;  %v2492_v58 = vpop.permute.xlu1 %738 }
 0x1b6   :  { %3166 = vst [vmem:[#allocation26_spill] sm:$0xff] %v2490_v57  ;;  %3167 = vst [vmem:[#allocation27_spill] sm:$0xff] %v2492_v58 }
 0x1b7   :  { %824 = vrot.lane.b32.xlu1 %v2394_v24, %s2172_s10 }
 0x1b9   :  { %v2498_v61 = vpop.permute.xlu0 %810  ;;  %v2500_v63 = vpop.permute.xlu1 %730 }
 0x1ba   :  { %3168 = vst [vmem:[#allocation28_spill] sm:$0xff] %v2498_v61  ;;  %3169 = vst [vmem:[#allocation29_spill] sm:$0xff] %v2500_v63 }
 0x1bb   :  { %904 = vrot.lane.b32.xlu1 %v2394_v24, %s2174_s12 }
 0x1bd   :  { %v2513_v11 = vpop.permute.xlu0 %898  ;;  %v317_v15 = vpop.permute.xlu1 %316 }
 0x1be   :  { %3170 = vst [vmem:[#allocation30_spill] sm:$0xff] %v2513_v11  ;;  %v323_v16 = vsel %vm322_vm2, %v2474_v48, %v317_v15  ;;  %v329_v18 = vsel %vm322_vm2, %v317_v15, %v2462_v42 }
 0x1bf   :  { %980 = vrot.lane.b32.xlu1 %v2270_v8, %s2175_s13  ;;  %v354_v15 = vmul.f32 %v2516_v12, %v329_v18  ;;  %v357_v0 = vmul.f32 %v2519_v13, %v323_v16  ;;  %v2558_v16 = vrot.slane %v492_v19, %v2511_v10 }
 0x1c1   :  { %v2544_v7 = vpop.permute.xlu0 %890  ;;  %v399_v6 = vpop.permute.xlu1 %398  ;;  %3179 = vst [vmem:[#allocation39_spill] sm:$0xff] %v2558_v16  ;;  %v373_v4 = vmul.f32 %v2296_v17, %v357_v0 }
 0x1c2   :  { %3177 = vst [vmem:[#allocation37_spill] sm:$0xff] %v2544_v7  ;;  %v403_v3 = vsel %vm402_vm3, %v2472_v47, %v399_v6  ;;  %v409_v18 = vsel %vm402_vm3, %v399_v6, %v2460_v41  ;;  %v2573_v6 = vrot.slane %v492_v19, %v2504_v2  ;;  %v2586_v19 = vld [vmem:[#allocation5 + $0x7] ss:$8 sm:$0xf] }
 0x1c3   :  { %v434_v31 = vmul.f32 %v2531_v21, %v409_v18  ;;  %v437_v35 = vmul.f32 %v2534_v23, %v403_v3  ;;  %975 = vperm.xlu1 %1978, %v2270_v8   ;;  %v2580_v18 = vrot.slane %v572_v36, %v2511_v10  ;;  %v370_v3 = vmul.f32 %v2296_v17, %v354_v15 }
 0x1c4   :  { %v2604_v23 = vrot.slane %v572_v36, %v2504_v2  ;;  %v2613_v21 = vrot.slane %v2586_v19, %v2502_v1  ;;  %v2619_v36 = vrot.slane %v2586_v19, %v2509_v9 }
 0x1c5   :  { %3182 = vst [vmem:[#allocation42_spill] sm:$0xff] %v2580_v18  ;;  %v450_v28 = vmul.f32 %v2384_v22, %v434_v31  ;;  %v453_v34 = vmul.f32 %v2384_v22, %v437_v35  ;;  %v309_v8 = vpop.permute.xlu0 %308  ;;  %v471_v13 = vpop.permute.xlu1 %470 }
 0x1c6   :  { %v325_v39 = vsel %vm322_vm2, %v309_v8, %v2474_v48  ;;  %v327_v12 = vsel %vm322_vm2, %v2462_v42, %v309_v8  ;;  %v485_v0 = vsel %vm482_vm4, %v471_v13, %v2486_v55  ;;  %v487_v31 = vsel %vm482_vm4, %v2468_v45, %v471_v13  ;;  %v2606_v48 = vld [vmem:[#allocation5 + $0x20] ss:$8 sm:$0xf] }
 0x1c7   :  { %v458_v35 = vadd.f32 %v450_v28, %v370_v3  ;;  %v461_v15 = vadd.f32 %v453_v34, %v373_v4  ;;  %3183 = vst [vmem:[#allocation43_spill] sm:$0xff] %v2606_v48  ;;  %v355_v42 = vmul.f32 %v2537_v26, %v327_v12  ;;  %v356_v8 = vmul.f32 %v2540_v56, %v325_v39 }
 0x1c8   :  { %v515_v28 = vmul.f32 %v2548_v40, %v487_v31  ;;  %v516_v34 = vmul.f32 %v2558_v16, %v485_v0  ;;  %v2630_v4 = vrot.slane %v2606_v48, %v2502_v1  ;;  %v2634_v0 = vrot.slane %v2606_v48, %v2509_v9 }
 0x1c9   :  { %v391_v13 = vpop.permute.xlu0 %390  ;;  %v479_v3 = vpop.permute.xlu1 %478  ;;  %v372_v16 = vmul.f32 %v2296_v17, %v356_v8 }
 0x1ca   :  { %v405_v39 = vsel %vm402_vm3, %v391_v13, %v2472_v47  ;;  %v407_v12 = vsel %vm402_vm3, %v2460_v41, %v391_v13  ;;  %v483_v47 = vsel %vm482_vm4, %v2486_v55, %v479_v3  ;;  %v489_v41 = vsel %vm482_vm4, %v479_v3, %v2468_v45 }
 0x1cb   :  { %v435_v31 = vmul.f32 %v2561_v59, %v407_v12  ;;  %v436_v56 = vmul.f32 %v2566_v5, %v405_v39  ;;  %v371_v13 = vmul.f32 %v2296_v17, %v355_v42  ;;  %v514_v40 = vmul.f32 %v2569_v43, %v489_v41 }
 0x1cc   :  { %v517_v26 = vmul.f32 %v2573_v6, %v483_v47  ;;  %v531_v12 = vmul.f32 %v2306_v38, %v515_v28  ;;  %v532_v39 = vmul.f32 %v2306_v38, %v516_v34 }
 0x1cd   :  { %v451_v5 = vmul.f32 %v2384_v22, %v435_v31  ;;  %v452_v55 = vmul.f32 %v2384_v22, %v436_v56  ;;  %v551_v59 = vpop.permute.xlu0 %550  ;;  %v559_v48 = vpop.permute.xlu1 %558  ;;  %v530_v45 = vmul.f32 %v2306_v38, %v514_v40 }
 0x1ce   :  { %v533_v42 = vmul.f32 %v2306_v38, %v517_v26  ;;  %v565_v17 = vsel %vm562_vm5, %v551_v59, %v2484_v51  ;;  %v567_v8 = vsel %vm562_vm5, %v2466_v44, %v551_v59  ;;  %v563_v38 = vsel %vm562_vm5, %v2484_v51, %v559_v48 }
 0x1cf   :  { %v459_v28 = vadd.f32 %v451_v5, %v371_v13  ;;  %v460_v34 = vadd.f32 %v452_v55, %v372_v16  ;;  %v595_v3 = vmul.f32 %v2577_v25, %v567_v8  ;;  %v596_v22 = vmul.f32 %v2580_v18, %v565_v17 }
 0x1d0   :  { %v538_v56 = vadd.f32 %v530_v45, %v458_v35  ;;  %v541_v31 = vadd.f32 %v533_v42, %v461_v15  ;;  %v569_v40 = vsel %vm562_vm5, %v559_v48, %v2466_v44  ;;  %v597_v35 = vmul.f32 %v2604_v23, %v563_v38 }
 0x1d1   :  { %v539_v26 = vadd.f32 %v531_v12, %v459_v28  ;;  %v540_v47 = vadd.f32 %v532_v39, %v460_v34  ;;  %v611_v59 = vmul.f32 %v2402_v27, %v595_v3  ;;  %v612_v16 = vmul.f32 %v2402_v27, %v596_v22  ;;  %v655_v5 = vpop.permute.xlu0 %654  ;;  %v735_v41 = vpop.permute.xlu1 %734 }
 0x1d2   :  { %v594_v13 = vmul.f32 %v2601_v37, %v569_v40  ;;  %v669_v51 = vsel %vm666_vm6, %v655_v5, %v2478_v49  ;;  %v671_v44 = vsel %vm666_vm6, %v2480_v50, %v655_v5  ;;  %v613_v45 = vmul.f32 %v2402_v27, %v597_v35 }
 0x1d3   :  { %v619_v15 = vadd.f32 %v611_v59, %v539_v26  ;;  %v620_v48 = vadd.f32 %v612_v16, %v540_v47  ;;  %v698_v12 = vmul.f32 %v2613_v21, %v671_v44  ;;  %v699_v39 = vmul.f32 %v2619_v36, %v669_v51 }
 0x1d4   :  { %v610_v55 = vmul.f32 %v2402_v27, %v594_v13  ;;  %v749_v42 = vsel %vm746_vm7, %v735_v41, %v2492_v58  ;;  %v751_v17 = vsel %vm746_vm7, %v2500_v63, %v735_v41  ;;  %v621_v40 = vadd.f32 %v613_v45, %v541_v31  ;;  %v3212_v58 = vld [vmem:[#allocation39_spill] sm:$0xff] }
 0x1d5   :  { %v643_v8 = vadd.f32 %v2324_v54, %v619_v15  ;;  %v714_v28 = vmul.f32 %v2422_v32, %v698_v12  ;;  %v715_v34 = vmul.f32 %v2422_v32, %v699_v39  ;;  %v815_v3 = vpop.permute.xlu0 %814  ;;  %v2691_v22 = vpop.permute.xlu1 %306  ;;  %v778_v27 = vmul.f32 %v2630_v4, %v751_v17 }
 0x1d6   :  { %v618_v38 = vadd.f32 %v610_v55, %v538_v56  ;;  %v779_v26 = vmul.f32 %v2634_v0, %v749_v42  ;;  %v637_v47 = vmul.f32 %v2310_v46, %v2338_v62  ;;  %v2700_v5 = vadd.f32 %v2320_v53, %v620_v48 }
 0x1d7   :  { %v723_v59 = vadd.f32 %v715_v34, %v643_v8  ;;  %v794_v35 = vmul.f32 %v2432_v33, %v778_v27  ;;  %v916_v27 = vld [vmem:[#allocation5 + $0x22] ss:$8 sm:$0xf] }
 0x1d8   :  { %v642_v16 = vadd.f32 %v2315_v52, %v618_v38  ;;  %v795_v54 = vmul.f32 %v2432_v33, %v779_v26  ;;  %3184 = vst [vmem:[#allocation44_spill] sm:$0xff] %v2700_v5  ;;  %v2704_v56 = vadd.f32 %v637_v47, %v621_v40  ;;  %v836_v40 = vld [vmem:[#allocation5 + $0x21] ss:$8 sm:$0xf]  ;;  %v2758_v33 = vmul.f32 %v2414_v30, %v2364_v14 }
 0x1d9   :  { %v895_v41 = vpop.permute.xlu0 %894  ;;  %v2702_v13 = vpop.permute.xlu1 %388  ;;  %v2740_v26 = vrot.slane %v836_v40, %v2502_v1  ;;  %v2743_v47 = vrot.slane %v836_v40, %v2509_v9 }
 0x1da   :  { %3185 = vst [vmem:[#allocation45_spill] sm:$0xff] %v2704_v56  ;;  %v722_v31 = vadd.f32 %v714_v28, %v642_v16  ;;  %v2707_v51 = vadd.f32 %v795_v54, %v723_v59  ;;  %v829_v16 = vsel %vm826_vm8, %v815_v3, %v2490_v57  ;;  %v831_v54 = vsel %vm826_vm8, %v2498_v61, %v815_v3  ;;  %v3198_v61 = vld [vmem:[#allocation33_spill] sm:$0xff] }
 0x1db   :  { %3188 = vst [vmem:[#allocation48_spill] sm:$0xff] %v2740_v26  ;;  %3189 = vst [vmem:[#allocation49_spill] sm:$0xff] %v2743_v47  ;;  %v2761_v56 = vrot.slane %v916_v27, %v2502_v1  ;;  %v909_v5 = vsel %vm906_vm9, %v895_v41, %v2513_v11  ;;  %v2768_v57 = vmul.f32 %v2414_v30, %v2408_v29 }
 0x1dc   :  { %v2709_v44 = vadd.f32 %v794_v35, %v722_v31  ;;  %v2754_v31 = vrot.slane %v916_v27, %v2509_v9  ;;  %v2772_v9 = vmul.f32 %v2414_v30, %v2378_v20  ;;  %v2776_v3 = vmul.f32 %v2414_v30, %v2394_v24 }
 0x1dd   :  { %v2711_v46 = vpop.permute.xlu0 %468  ;;  %v2713_v52 = vpop.permute.xlu1 %548  ;;  %3192 = vst [vmem:[#allocation52_spill] sm:$0xff] %v2761_v56  ;;  %v911_v14 = vsel %vm906_vm9, %v2544_v7, %v895_v41  ;;  %v858_v1 = vmul.f32 %v2740_v26, %v831_v54  ;;  %v859_v11 = vmul.f32 %v2743_v47, %v829_v16  ;;  %v2797_v41 = vrot.slane %v2586_v19, %v2511_v10 }
 0x1de   :  { %3191 = vst [vmem:[#allocation51_spill] sm:$0xff] %v2754_v31  ;;  %3193 = vst [vmem:[#allocation53_spill] sm:$0xff] %v2772_v9  ;;  %v939_v24 = vmul.f32 %v2754_v31, %v909_v5  ;;  %v2801_v16 = vrot.slane %v2586_v19, %v2504_v2  ;;  %v938_v54 = vmul.f32 %v2761_v56, %v911_v14  ;;  %v3195_v5 = vld [vmem:[#allocation43_spill] sm:$0xff]  ;;  %v3199_v31 = vld [vmem:[#allocation34_spill] sm:$0xff] }
 0x1df   :  { %3194 = vst [vmem:[#allocation54_spill] sm:$0xff] %v2776_v3  ;;  %v2809_v3 = vrot.slane %v3195_v5, %v2511_v10  ;;  %v2813_v7 = vrot.slane %v3195_v5, %v2504_v2  ;;  %v3201_v56 = vld [vmem:[#allocation23_spill] sm:$0xff] }
 0x1e1   :  { %v2715_v62 = vpop.permute.xlu0 %652  ;;  %v2717_v53 = vpop.permute.xlu1 %314  ;;  %3196 = vst [vmem:[#allocation43_spill] sm:$0xff] %v2809_v3  ;;  %3197 = vst [vmem:[#allocation55_spill] sm:$0xff] %v2813_v7  ;;  %v875_v3 = vmul.f32 %v3201_v56, %v859_v11  ;;  %v2828_v7 = vrot.slane %v836_v40, %v2504_v2 }
 0x1e3   :  { %3203 = vst [vmem:[#allocation34_spill] sm:$0xff] %v2828_v7 }
 0x1e5   :  { %v2719_v15 = vpop.permute.xlu0 %476  ;;  %v2721_v48 = vpop.permute.xlu1 %396 }
 0x1e9   :  { %v2723_v12 = vpop.permute.xlu1 %660  ;;  %v2725_v39 = vpop.permute.xlu0 %740 }
 0x1ed   :  { %v2727_v55 = vpop.permute.xlu1 %732  ;;  %v319_v45 = vpop.permute.xlu0 %318 }
 0x1ee   :  { %v330_v30 = vsel %vm322_vm2, %v319_v45, %v2691_v22 }
 0x1f1   :  { %v2729_v42 = vpop.permute.xlu1 %556  ;;  %v401_v8 = vpop.permute.xlu0 %400 }
 0x1f2   :  { %v404_v29 = vsel %vm402_vm3, %v2721_v48, %v401_v8  ;;  %v410_v20 = vsel %vm402_vm3, %v401_v8, %v2702_v13  ;;  %v324_v8 = vsel %vm322_vm2, %v2717_v53, %v319_v45  ;;  %v2822_v45 = vrot.slane %v836_v40, %v2511_v10  ;;  %v3207_v40 = vld [vmem:[#allocation35_spill] sm:$0xff] }
 0x1f3   :  { %v438_v63 = vmul.f32 %v3198_v61, %v410_v20  ;;  %v441_v32 = vmul.f32 %v3199_v31, %v404_v29  ;;  %v3204_v31 = vld [vmem:[#allocation24_spill] sm:$0xff] }
 0x1f4   :  { %3200 = vst [vmem:[#allocation33_spill] sm:$0xff] %v2822_v45  ;;  %v955_v29 = vmul.f32 %v3204_v31, %v939_v24  ;;  %v3205_v20 = vld [vmem:[#allocation32_spill] sm:$0xff]  ;;  %v2836_v45 = vrot.slane %v916_v27, %v2511_v10 }
 0x1f5   :  { %v2731_v17 = vpop.permute.xlu1 %820  ;;  %v473_v34 = vpop.permute.xlu0 %472  ;;  %v361_v18 = vmul.f32 %v3205_v20, %v324_v8 }
 0x1f6   :  { %v486_v11 = vsel %vm482_vm4, %v473_v34, %v2719_v15 }
 0x1f7   :  { %v520_v47 = vmul.f32 %v3212_v58, %v486_v11 }
 0x1f9   :  { %v2733_v28 = vpop.permute.xlu1 %812  ;;  %v561_v35 = vpop.permute.xlu0 %560 }
 0x1fa   :  { %3186 = vst [vmem:[#allocation46_spill] sm:$0xff] %v2733_v28  ;;  %v570_v10 = vsel %vm562_vm5, %v561_v35, %v2713_v52 }
 0x1fd   :  { %v2735_v38 = vpop.permute.xlu1 %900  ;;  %v663_v19 = vpop.permute.xlu0 %662 }
 0x1fe   :  { %3187 = vst [vmem:[#allocation47_spill] sm:$0xff] %v2735_v38  ;;  %v3202_v38 = vld [vmem:[#allocation31_spill] sm:$0xff] }
 0x1ff   :  { %v358_v5 = vmul.f32 %v3202_v38, %v330_v30  ;;  %3206 = vst [vmem:[#allocation31_spill] sm:$0xff] %v2836_v45  ;;  %v488_v38 = vsel %vm482_vm4, %v2711_v46, %v473_v34  ;;  %v3208_v30 = vld [vmem:[#allocation15_spill] sm:$0xff]  ;;  %v3210_v45 = vld [vmem:[#allocation14_spill] sm:$0xff]  ;;  %v2856_v34 = vrot.slane %v916_v27, %v2504_v2 }
 0x200   :  { %v454_v8 = vmul.f32 %v3208_v30, %v438_v63  ;;  %v457_v20 = vmul.f32 %v3208_v30, %v441_v32  ;;  %v377_v63 = vmul.f32 %v3210_v45, %v361_v18 }
 0x201   :  { %v2745_v59 = vpop.permute.xlu1 %892  ;;  %v374_v7 = vmul.f32 %v3210_v45, %v358_v5  ;;  %v737_v26 = vpop.permute.xlu0 %736  ;;  %v667_v5 = vsel %vm666_vm6, %v2478_v49, %v663_v19  ;;  %v3214_v49 = vld [vmem:[#allocation16_spill] sm:$0xff] }
 0x202   :  { %3190 = vst [vmem:[#allocation50_spill] sm:$0xff] %v2745_v59  ;;  %v874_v59 = vmul.f32 %v3201_v56, %v858_v1  ;;  %v954_v1 = vmul.f32 %v3204_v31, %v938_v54  ;;  %v883_v56 = vadd.f32 %v875_v3, %v2707_v51  ;;  %v598_v51 = vmul.f32 %v2601_v37, %v570_v10 }
 0x203   :  { %v462_v18 = vadd.f32 %v454_v8, %v374_v7  ;;  %v2871_v3 = vadd.f32 %v457_v20, %v377_v63  ;;  %v752_v37 = vsel %vm746_vm7, %v2727_v55, %v737_v26  ;;  %v3215_v63 = vld [vmem:[#allocation21_spill] sm:$0xff] }
 0x204   :  { %v882_v31 = vadd.f32 %v874_v59, %v2709_v44  ;;  %v564_v44 = vsel %vm562_vm5, %v2729_v42, %v561_v35  ;;  %v2867_v2 = vadd.f32 %v955_v29, %v883_v56  ;;  %v3213_v29 = vld [vmem:[#allocation17_spill] sm:$0xff]  ;;  %v614_v11 = vmul.f32 %v3214_v49, %v598_v51 }
 0x205   :  { %v2789_v9 = vpop.permute.xlu1 %310  ;;  %v743_v8 = vpop.permute.xlu0 %742 }
 0x206   :  { %v328_v14 = vsel %vm322_vm2, %v2691_v22, %v2789_v9  ;;  %v2869_v27 = vadd.f32 %v954_v1, %v882_v31  ;;  %v601_v1 = vmul.f32 %v2604_v23, %v564_v44  ;;  %v700_v23 = vmul.f32 %v2797_v41, %v667_v5  ;;  %v3217_v44 = vld [vmem:[#allocation41_spill] sm:$0xff] }
 0x207   :  { %v359_v24 = vmul.f32 %v3207_v40, %v328_v14  ;;  %v3211_v40 = vld [vmem:[#allocation38_spill] sm:$0xff] }
 0x208   :  { %v519_v32 = vmul.f32 %v3211_v40, %v488_v38  ;;  %v3216_v40 = vld [vmem:[#allocation36_spill] sm:$0xff] }
 0x209   :  { %v393_v61 = vpop.permute.xlu1 %392  ;;  %v375_v59 = vmul.f32 %v3210_v45, %v359_v24  ;;  %v782_v24 = vmul.f32 %v2630_v4, %v752_v37 }
 0x20a   :  { %v408_v22 = vsel %vm402_vm3, %v2702_v13, %v393_v61  ;;  %v3209_v13 = vld [vmem:[#allocation40_spill] sm:$0xff]  ;;  %v535_v7 = vmul.f32 %v3213_v29, %v519_v32 }
 0x20b   :  { %v439_v54 = vmul.f32 %v3209_v13, %v408_v22  ;;  %v2885_v22 = vmul.f32 %v3213_v29, %v520_v47  ;;  %v673_v47 = vsel %vm666_vm6, %v663_v19, %v2480_v50 }
 0x20d   :  { %v481_v14 = vpop.permute.xlu1 %480  ;;  %v455_v28 = vmul.f32 %v3208_v30, %v439_v54 }
 0x20e   :  { %v490_v58 = vsel %vm482_vm4, %v481_v14, %v2711_v46  ;;  %v484_v4 = vsel %vm482_vm4, %v2719_v15, %v481_v14 }
 0x20f   :  { %v463_v35 = vadd.f32 %v455_v28, %v375_v59  ;;  %v518_v56 = vmul.f32 %v2569_v43, %v490_v58  ;;  %v750_v28 = vsel %vm746_vm7, %v737_v26, %v2725_v39  ;;  %v406_v26 = vsel %vm402_vm3, %v393_v61, %v2721_v48  ;;  %v3218_v58 = vld [vmem:[#allocation18_spill] sm:$0xff] }
 0x210   :  { %v783_v50 = vmul.f32 %v2634_v0, %v750_v28  ;;  %v701_v48 = vmul.f32 %v2801_v16, %v673_v47  ;;  %v798_v0 = vmul.f32 %v3215_v63, %v782_v24  ;;  %v440_v15 = vmul.f32 %v3217_v44, %v406_v26  ;;  %v3221_v28 = vld [vmem:[#allocation49_spill] sm:$0xff] }
 0x211   :  { %v553_v31 = vpop.permute.xlu1 %552  ;;  %v534_v43 = vmul.f32 %v3213_v29, %v518_v56  ;;  %v521_v51 = vmul.f32 %v2573_v6, %v484_v4  ;;  %v823_v6 = vpop.permute.xlu0 %822 }
 0x212   :  { %v568_v46 = vsel %vm562_vm5, %v2713_v52, %v553_v31  ;;  %v326_v52 = vsel %vm322_vm2, %v2789_v9, %v2717_v53 }
 0x213   :  { %v599_v38 = vmul.f32 %v2577_v25, %v568_v46  ;;  %v542_v20 = vadd.f32 %v534_v43, %v462_v18  ;;  %v543_v25 = vadd.f32 %v535_v7, %v463_v35  ;;  %v360_v32 = vmul.f32 %v3216_v40, %v326_v52  ;;  %v3219_v7 = vld [vmem:[#allocation46_spill] sm:$0xff]  ;;  %v3220_v46 = vld [vmem:[#allocation48_spill] sm:$0xff] }
 0x214   :  { %v799_v35 = vmul.f32 %v3215_v63, %v783_v50  ;;  %v456_v52 = vmul.f32 %v3208_v30, %v440_v15  ;;  %v3224_v50 = vld [vmem:[#allocation42_spill] sm:$0xff]  ;;  %v617_v30 = vmul.f32 %v3214_v49, %v601_v1  ;;  %v3232_v1 = vld [vmem:[#allocation25_spill] sm:$0xff] }
 0x215   :  { %v615_v10 = vmul.f32 %v3214_v49, %v599_v38  ;;  %v657_v13 = vpop.permute.xlu1 %656  ;;  %v622_v19 = vadd.f32 %v614_v11, %v542_v20  ;;  %v3222_v38 = vld [vmem:[#allocation27_spill] sm:$0xff]  ;;  %v376_v24 = vmul.f32 %v3210_v45, %v360_v32  ;;  %v537_v20 = vmul.f32 %v3213_v29, %v521_v51 }
 0x216   :  { %v670_v53 = vsel %vm666_vm6, %v657_v13, %v2723_v12  ;;  %v672_v9 = vsel %vm666_vm6, %v2715_v62, %v657_v13  ;;  %v747_v47 = vsel %vm746_vm7, %v3222_v38, %v743_v8  ;;  %v3227_v29 = vld [vmem:[#allocation19_spill] sm:$0xff] }
 0x217   :  { %v623_v61 = vadd.f32 %v615_v10, %v543_v25  ;;  %v702_v54 = vmul.f32 %v2613_v21, %v672_v9  ;;  %v703_v14 = vmul.f32 %v2619_v36, %v670_v53  ;;  %v646_v59 = vadd.f32 %v2758_v33, %v622_v19  ;;  %v3223_v10 = vld [vmem:[#allocation22_spill] sm:$0xff]  ;;  %v3225_v9 = vld [vmem:[#allocation47_spill] sm:$0xff] }
 0x218   :  { %v566_v33 = vsel %vm562_vm5, %v553_v31, %v2729_v42  ;;  %v3229_v32 = vld [vmem:[#allocation51_spill] sm:$0xff]  ;;  %v717_v15 = vmul.f32 %v3227_v29, %v701_v48 }
 0x219   :  { %v647_v18 = vadd.f32 %v2768_v57, %v623_v61  ;;  %v718_v5 = vmul.f32 %v3218_v58, %v702_v54  ;;  %v817_v37 = vpop.permute.xlu1 %816  ;;  %v719_v21 = vmul.f32 %v3218_v58, %v703_v14  ;;  %v600_v4 = vmul.f32 %v3224_v50, %v566_v33  ;;  %v3226_v61 = vld [vmem:[#allocation50_spill] sm:$0xff]  ;;  %v3230_v14 = vld [vmem:[#allocation29_spill] sm:$0xff] }
 0x21a   :  { %v830_v56 = vsel %vm826_vm8, %v817_v37, %v2731_v17  ;;  %v832_v36 = vsel %vm826_vm8, %v3219_v7, %v817_v37  ;;  %v716_v54 = vmul.f32 %v3227_v29, %v700_v23  ;;  %v753_v51 = vsel %vm746_vm7, %v743_v8, %v3230_v14  ;;  %v903_v37 = vpop.permute.xlu0 %902 }
 0x21b   :  { %v726_v57 = vadd.f32 %v718_v5, %v646_v59  ;;  %v862_v11 = vmul.f32 %v3220_v46, %v832_v36  ;;  %v863_v43 = vmul.f32 %v3221_v28, %v830_v56  ;;  %v727_v26 = vadd.f32 %v719_v21, %v647_v18  ;;  %v3231_v59 = vld [vmem:[#allocation43_spill] sm:$0xff]  ;;  %v3234_v28 = vld [vmem:[#allocation26_spill] sm:$0xff] }
 0x21c   :  { %v780_v18 = vmul.f32 %v3231_v59, %v747_v47  ;;  %v464_v5 = vadd.f32 %v456_v52, %v376_v24  ;;  %v545_v33 = vadd.f32 %v537_v20, %v2871_v3  ;;  %v616_v48 = vmul.f32 %v3214_v49, %v600_v4  ;;  %v3233_v46 = vld [vmem:[#allocation55_spill] sm:$0xff]  ;;  %v3235_v24 = vld [vmem:[#allocation28_spill] sm:$0xff]  ;;  %v3236_v49 = vld [vmem:[#allocation30_spill] sm:$0xff] }
 0x21d   :  { %v806_v25 = vadd.f32 %v798_v0, %v726_v57  ;;  %v878_v13 = vmul.f32 %v3223_v10, %v862_v11  ;;  %v879_v42 = vmul.f32 %v3223_v10, %v863_v43  ;;  %v897_v31 = vpop.permute.xlu1 %896  ;;  %v807_v53 = vadd.f32 %v799_v35, %v727_v26  ;;  %v3228_v0 = vld [vmem:[#allocation52_spill] sm:$0xff]  ;;  %v3237_v52 = vld [vmem:[#allocation37_spill] sm:$0xff] }
 0x21e   :  { %v910_v19 = vsel %vm906_vm9, %v897_v31, %v3225_v9  ;;  %v912_v45 = vsel %vm906_vm9, %v3226_v61, %v897_v31  ;;  %v781_v11 = vmul.f32 %v3233_v46, %v753_v51  ;;  %v827_v43 = vsel %vm826_vm8, %v3234_v28, %v823_v6 }
 0x21f   :  { %v942_v40 = vmul.f32 %v3228_v0, %v912_v45  ;;  %v943_v44 = vmul.f32 %v3229_v32, %v910_v19  ;;  %v886_v35 = vadd.f32 %v878_v13, %v806_v25  ;;  %v887_v21 = vadd.f32 %v879_v42, %v807_v53  ;;  %v3241_v0 = vld [vmem:[#allocation33_spill] sm:$0xff] }
 0x220   :  { %v833_v3 = vsel %vm826_vm8, %v823_v6, %v3235_v24  ;;  %v544_v26 = vadd.f32 %v2885_v22, %v464_v5  ;;  %v625_v6 = vadd.f32 %v617_v30, %v545_v33  ;;  %v3238_v22 = vld [vmem:[#allocation44_spill] sm:$0xff]  ;;  %v3244_v5 = vld [vmem:[#allocation53_spill] sm:$0xff] }
 0x221   :  { %v958_v56 = vmul.f32 %v3232_v1, %v942_v40  ;;  %v959_v23 = vmul.f32 %v3232_v1, %v943_v44  ;;  %v665_v36 = vpop.permute.xlu1 %664  ;;  %v724_v19 = vadd.f32 %v716_v54, %v3238_v22  ;;  %v860_v40 = vmul.f32 %v3241_v0, %v827_v43  ;;  %v979_v44 = vpop.permute.xlu0 %978 }
 0x222   :  { %v668_v8 = vsel %vm666_vm6, %v2723_v12, %v665_v36  ;;  %v674_v57 = vsel %vm666_vm6, %v665_v36, %v2715_v62  ;;  %v907_v12 = vsel %vm906_vm9, %v3236_v49, %v903_v37  ;;  %v913_v62 = vsel %vm906_vm9, %v903_v37, %v3237_v52 }
 0x223   :  { %v966_v38 = vadd.f32 %v958_v56, %v886_v35  ;;  %v967_v47 = vadd.f32 %v959_v23, %v887_v21  ;;  %v704_v20 = vmul.f32 %v2797_v41, %v668_v8  ;;  %v705_v25 = vmul.f32 %v2801_v16, %v674_v57  ;;  %v3239_v41 = vld [vmem:[#allocation45_spill] sm:$0xff]  ;;  %v3246_v57 = vld [vmem:[#allocation23_spill] sm:$0xff] }
 0x224   :  { %v624_v50 = vadd.f32 %v616_v48, %v544_v26  ;;  %v725_v45 = vadd.f32 %v717_v15, %v3239_v41  ;;  %v941_v54 = vmul.f32 %v2856_v34, %v913_v62 }
 0x225   :  { %v745_v13 = vpop.permute.xlu1 %744  ;;  %v1908_v42 = vpack.c.bf16 %v967_v47, %v2867_v2  ;;  %v1910_v31 = vpack.c.bf16 %v966_v38, %v2869_v27  ;;  %v3240_v27 = vld [vmem:[#allocation20_spill] sm:$0xff]  ;;  %v720_v15 = vmul.f32 %v3218_v58, %v704_v20  ;;  %v721_v51 = vmul.f32 %v3218_v58, %v705_v25 }
 0x226   :  { %v748_v4 = vsel %vm746_vm7, %v2725_v39, %v745_v13  ;;  %v754_v53 = vsel %vm746_vm7, %v745_v13, %v2727_v55  ;;  %v796_v30 = vmul.f32 %v3240_v27, %v780_v18  ;;  %v797_v29 = vmul.f32 %v3240_v27, %v781_v11  ;;  %v3242_v39 = vld [vmem:[#allocation34_spill] sm:$0xff]  ;;  %v3243_v55 = vld [vmem:[#allocation31_spill] sm:$0xff]  ;;  %v3248_v47 = vld [vmem:[#allocation24_spill] sm:$0xff] }
 0x227   :  { %v784_v16 = vmul.f32 %v3231_v59, %v748_v4  ;;  %v785_v2 = vmul.f32 %v3233_v46, %v754_v53  ;;  %1909 = vmatprep.subr.bf16.mxu0 %v1908_v42  ;;  %v861_v32 = vmul.f32 %v3242_v39, %v833_v3  ;;  %v940_v14 = vmul.f32 %v3243_v55, %v907_v12  ;;  %v3245_v18 = vld [vmem:[#allocation54_spill] sm:$0xff] }
 0x228   :  { %1911 = vmatpush1.bf16.msra.mxu0 %v1910_v31  ;;  %v648_v37 = vadd.f32 %v3244_v5, %v624_v50  ;;  %v649_v35 = vadd.f32 %v3245_v18, %v625_v6  ;;  %v804_v48 = vadd.f32 %v796_v30, %v724_v19  ;;  %v805_v8 = vadd.f32 %v797_v29, %v725_v45  ;;  %v972_v19 = vpop.permute.xlu0 %971 }
 0x229   :  { %v825_v59 = vpop.permute.xlu1 %824  ;;  %v800_v23 = vmul.f32 %v3215_v63, %v784_v16  ;;  %v801_v36 = vmul.f32 %v3215_v63, %v785_v2  ;;  %v876_v46 = vmul.f32 %v3246_v57, %v860_v40  ;;  %v3247_v11 = vmov 0.0  }
 0x22a   :  { %v828_v21 = vsel %vm826_vm8, %v2731_v17, %v825_v59  ;;  %v834_v56 = vsel %vm826_vm8, %v825_v59, %v3219_v7  ;;  %v877_v17 = vmul.f32 %v3246_v57, %v861_v32  ;;  %v728_v28 = vadd.f32 %v720_v15, %v648_v37 }
 0x22b   :  { %v864_v33 = vmul.f32 %v3241_v0, %v828_v21  ;;  %v865_v58 = vmul.f32 %v3242_v39, %v834_v56  ;;  %1869 = vmatmul.mubr.msk.f32.vlgmr.msra.gmra.mrb[4].mxu0 %vm982_vm10, %v979_v44  ;;  %v729_v7 = vadd.f32 %v721_v51, %v649_v35  ;;  %v956_v24 = vmul.f32 %v3248_v47, %v940_v14 }
 0x22c   :  { %1057 = vmatprep.mubr.f32.mxu0 %v3247_v11  ;;  %v957_v3 = vmul.f32 %v3248_v47, %v941_v54  ;;  %v808_v52 = vadd.f32 %v800_v23, %v728_v28  ;;  %v885_v25 = vadd.f32 %v877_v17, %v805_v8 }
 0x22d   :  { %v880_v43 = vmul.f32 %v3223_v10, %v864_v33  ;;  %v881_v63 = vmul.f32 %v3223_v10, %v865_v58  ;;  %v905_v38 = vpop.permute.xlu1 %904  ;;  %v809_v62 = vadd.f32 %v801_v36, %v729_v7  ;;  %v884_v10 = vadd.f32 %v876_v46, %v804_v48 }
 0x22e   :  { %v908_v49 = vsel %vm906_vm9, %v3225_v9, %v905_v38  ;;  %v914_v12 = vsel %vm906_vm9, %v905_v38, %v3226_v61  ;;  %v965_v61 = vadd.f32 %v957_v3, %v885_v25 }
 0x22f   :  { %v944_v26 = vmul.f32 %v3243_v55, %v908_v49  ;;  %v945_v20 = vmul.f32 %v2856_v34, %v914_v12  ;;  %v888_v13 = vadd.f32 %v880_v43, %v808_v52  ;;  %v889_v42 = vadd.f32 %v881_v63, %v809_v62  ;;  %v3052_v34 = vld [vmem:[%s3098_s3] sm:$0xf] }
 0x230   :  { %v964_v9 = vadd.f32 %v956_v24, %v884_v10 }
 0x231   :  { %v960_v31 = vmul.f32 %v3232_v1, %v944_v26  ;;  %v961_v6 = vmul.f32 %v3232_v1, %v945_v20  ;;  %v981_v50 = vpop.permute.xlu1 %980  ;;  %v2177_v1 = vmov 18  }
 0x232   :  { %1870 = vmatmul.mubr.msk.f32.gmra.mrb[6].mxu0 %vm982_vm10, %v981_v50  ;;  %1979 = vset.pattern.permute.xlu1 %v2177_v1 }
 0x233   :  { %v968_v60 = vadd.f32 %v960_v31, %v888_v13  ;;  %v969_v4 = vadd.f32 %v961_v6, %v889_v42  ;;  %1268 = vmatprep.mubr.f32.mxu0 %v3247_v11  ;;  %1199 = vperm.xlu1 %1979, %v3052_v34  }
 0x235   :  { %v1912_v53 = vpack.c.bf16 %v969_v4, %v965_v61  ;;  %v1914_v22 = vpack.c.bf16 %v968_v60, %v964_v9 }
 0x237   :  { %1913 = vmatprep.subr.bf16.mxu1 %v1912_v53  ;;  %1575 = vrot.lane.b32.xlu1 %v3052_v34, %s2172_s10 }
 0x238   :  { %1915 = vmatpush1.bf16.msra.mxu1 %v1914_v22 }
 0x23b   :  { %1871 = vmatmul.mubr.msk.f32.vlgmr.msra.gmra.mrb[4].mxu1 %vm982_vm10, %v979_v44 }
 0x23c   :  { %1134 = vmatprep.mubr.f32.mxu1 %v3247_v11 }
 0x23f   :  { %1872 = vmatmul.mubr.msk.f32.gmra.mrb[6].mxu1 %vm982_vm10, %v981_v50 }
 0x240   :  { %1339 = vmatprep.mubr.f32.mxu1 %v3247_v11 }
 0x242   :  { %v976_v29 = vpop.permute.xlu1 %975 }
 0x2fe   :  { %v1053_v41 = vpop.f32.mrb[4].mxu0 }
 0x2ff   :  { %v1054_v45 = vadd.f32 %v1053_v41, %v972_v19  ;;  %v1055_v16 = vpop.f32.mrb[5].mxu0  ;;  %v1346_v41 = vld [vmem:[#allocation5] sm:$0x3] }
 0x300   :  { %v1056_v2 = vadd.f32 %v1055_v16, %v972_v19  ;;  %v1200_v16 = vpop.permute.xlu1 %1199 }
 0x301   :  { %v1873_v27 = vmul.f32 -1.442695, %v1054_v45 }
 0x302   :  { %v1874_v30 = vmul.f32 -1.442695, %v1056_v2 }
 0x303   :  { %2017 = vpow2.f32 %v1873_v27 }
 0x304   :  { %2019 = vpow2.f32 %v1874_v30 }
 0x305   :  { %v1059_v0 = vpop.f32.mrb[6].mxu0 }
 0x306   :  { %v1060_v40 = vadd.f32 %v1059_v0, %v976_v29  ;;  %v1061_v39 = vpop.f32.mrb[7].mxu0  ;;  %v1348_v0 = vld [vmem:[#allocation5 + $0x10] sm:$0x3] }
 0x307   :  { %v1062_v32 = vadd.f32 %v1061_v39, %v976_v29 }
 0x308   :  { %v1877_v44 = vmul.f32 -1.442695, %v1060_v40 }
 0x309   :  { %v1878_v55 = vmul.f32 -1.442695, %v1062_v32 }
 0x30a   :  { %2021 = vpow2.f32 %v1877_v44 }
 0x30b   :  { %2023 = vpow2.f32 %v1878_v55  ;;  %v65_v55 = vld [vmem:[%s3099_s4] sm:$0x3]  ;;  %s2181_s4 = smov [#allocation8]  }
 0x30c   :  { %s1843_s17 = sshll.u32 %s2181_s4, 4  ;;  %s1844_s17 = int_to_ptr.vmem [resolvable:$true] %s1843_s17 }
 0x30d   :  { %v2018_v14 = vpop.eup %2017  ;;  %s2121_s1 = scalar_lea.vmem %s1844_s17, 256  ;;  %p2126_p11 = scmp.lt.s32.totalorder %s1844_s17, %s1844_s17 }
 0x30e   :  { %v1130_v54 = vpop.f32.mrb[4].mxu1  ;;  %v2020_v15 = vpop.eup %2019  ;;  %v1165_v37 = vadd.f32 1.0, %v2018_v14  ;;  %v2179_v14 = vmov 4   ;;  %p2122_p10 = scmp.ne.s32.totalorder %s1844_s17, %s2121_s1  ;;  %p2127_p12 = scmp.lt.s32.totalorder %s2121_s1, %s2121_s1 }
 0x30f   :  { %v1131_v51 = vadd.f32 %v1130_v54, %v972_v19  ;;  %v1132_v59 = vpop.f32.mrb[5].mxu1  ;;  %v1166_v35 = vadd.f32 1.0, %v2020_v15  ;;  %1980 = vset.pattern.permute.xlu0 %v2179_v14 }
 0x310   :  { %v1133_v5 = vadd.f32 %v1132_v59, %v972_v19  ;;  %v1347_v19 = vld [vmem:[#allocation5 + $0x8] sm:$0x3]  ;;  %1492 = vperm.xlu0 %1980, %v65_v55   ;;  %p2128_p13 = por %p2127_p12, %p2126_p11 }
 0x311   :  { %v1875_v18 = vmul.f32 -1.442695, %v1131_v51 }
 0x312   :  { %v1876_v21 = vmul.f32 -1.442695, %v1133_v5  ;;  %v1136_v56 = vpop.f32.mrb[6].mxu1  ;;  %p2129_p0 = pnand %p2128_p13, %p2122_p10 }
 0x313   :  { %2025 = vpow2.f32 %v1875_v18  ;;  %v1137_v23 = vadd.f32 %v1136_v56, %v976_v29  ;;  %v1138_v36 = vpop.f32.mrb[7].mxu1 }
 0x314   :  { %v2022_v33 = vpop.eup %2021  ;;  %2027 = vpow2.f32 %v1876_v21  ;;  %v1139_v58 = vadd.f32 %v1138_v36, %v976_v29  ;;  %v1576_v21 = vpop.permute.xlu1 %1575 }
 0x315   :  { %v2024_v48 = vpop.eup %2023  ;;  %2029 = vrcp.f32 %v1165_v37  ;;  %v1169_v8 = vadd.f32 1.0, %v2022_v33  ;;  %v1879_v57 = vmul.f32 -1.442695, %v1137_v23 }
 0x316   :  { %2031 = vrcp.f32 %v1166_v35  ;;  %v1170_v46 = vadd.f32 1.0, %v2024_v48  ;;  %v1880_v17 = vmul.f32 -1.442695, %v1139_v58 }
 0x317   :  { %2033 = vrcp.f32 %v1169_v8 }
 0x318   :  { %2035 = vrcp.f32 %v1170_v46 }
 0x319   :  { %2037 = vpow2.f32 %v1879_v57 }
 0x31a   :  { %2039 = vpow2.f32 %v1880_v17 }
 0x31d   :  { %v2026_v28 = vpop.eup %2025 }
 0x31e   :  { %v2028_v7 = vpop.eup %2027  ;;  %v1167_v38 = vadd.f32 1.0, %v2026_v28 }
 0x31f   :  { %v2030_v43 = vpop.eup %2029  ;;  %v1168_v24 = vadd.f32 1.0, %v2028_v7 }
 0x320   :  { %v2032_v63 = vpop.eup %2031  ;;  %v1189_v49 = vmul.f32 %v2030_v43, %v1054_v45  ;;  %2041 = vrcp.f32 %v1167_v38  ;;  %v1349_v45 = vld [vmem:[#allocation5 + $0x18] sm:$0x3]  ;;  %v2053_v38 = vld [vmem:[#allocation2] sm:$0xff] }
 0x321   :  { %v2034_v47 = vpop.eup %2033  ;;  %v1190_v62 = vmul.f32 %v2032_v63, %v1056_v2  ;;  %2043 = vrcp.f32 %v1168_v24  ;;  %v2054_v24 = vld [vmem:[#allocation2 + $0x8] sm:$0xff] }
 0x322   :  { %v2036_v3 = vpop.eup %2035  ;;  %v1193_v12 = vmul.f32 %v2034_v47, %v1060_v40 }
 0x323   :  { %v2038_v52 = vpop.eup %2037  ;;  %v1194_v26 = vmul.f32 %v2036_v3, %v1062_v32 }
 0x324   :  { %v2040_v20 = vpop.eup %2039  ;;  %v1918_v10 = vpack.c.bf16 %v1193_v12, %v1189_v49  ;;  %v1171_v25 = vadd.f32 1.0, %v2038_v52  ;;  %v3249_v49 = vld [vmem:[#allocation12_spill] sm:$0xff]  ;;  %v3250_v52 = vld [vmem:[#allocation13_spill] sm:$0xff] }
 0x325   :  { %v1172_v13 = vadd.f32 1.0, %v2040_v20  ;;  %v1916_v42 = vpack.c.bf16 %v1194_v26, %v1190_v62 }
 0x326   :  { %2045 = vrcp.f32 %v1171_v25 }
 0x327   :  { %2047 = vrcp.f32 %v1172_v13  ;;  %1917 = vmatprep.subr.bf16.mxu0 %v1916_v42 }
 0x328   :  { %1919 = vmatpush1.bf16.msra.mxu0 %v1918_v10 }
 0x329   :  { %1350 = vmatprep.subr.mxu0 %v1347_v19 }
 0x32a   :  { %v2042_v31 = vpop.eup %2041 }
 0x32b   :  { %1881 = vmatmul.mubr.msk.f32.vlgmr.msra.gmra.mrb[8].mxu0 %vm982_vm10, %v3052_v34  ;;  %v2044_v6 = vpop.eup %2043  ;;  %v1191_v60 = vmul.f32 %v2042_v31, %v1131_v51  ;;  %v2180_v51 = vmov 19  }
 0x32c   :  { %v1192_v4 = vmul.f32 %v2044_v6, %v1133_v5  ;;  %1981 = vset.pattern.permute.xlu1 %v2180_v51  ;;  %1982 = vset.pattern.permute.xlu0 %v2180_v51 }
 0x32d   :  { %1572 = vperm.xlu1 %1981, %v3052_v34  }
 0x330   :  { %v2046_v50 = vpop.eup %2045 }
 0x331   :  { %v2048_v9 = vpop.eup %2047  ;;  %v1195_v61 = vmul.f32 %v2046_v50, %v1137_v23  ;;  %1351 = vmatpush1.xpose.msra.mxu0 %v1346_v41 }
 0x332   :  { %v1196_v53 = vmul.f32 %v2048_v9, %v1139_v58  ;;  %1420 = vmatprep.subr.mxu0 %v1349_v45 }
 0x333   :  { %v1922_v22 = vpack.c.bf16 %v1195_v61, %v1191_v60 }
 0x334   :  { %v1920_v1 = vpack.c.bf16 %v1196_v53, %v1192_v4 }
 0x336   :  { %1921 = vmatprep.subr.bf16.mxu1 %v1920_v1 }
 0x337   :  { %1923 = vmatpush1.bf16.msra.mxu1 %v1922_v22 }
 0x338   :  { %1898 = vmatprep.subr.mxu1 %v3247_v11 }
 0x33a   :  { %1882 = vmatmul.mubr.msk.f32.vlgmr.msra.gmra.mrb[8].mxu1 %vm982_vm10, %v3052_v34 }
 0x33b   :  { %1900 = vmatprep.mubr.msk.f32.mxu1 %vm2178_vm11, %v3247_v11 }
 0x38f   :  { %v1493_v59 = vpop.permute.xlu0 %1492 }
 0x3ac   :  { %v1573_v56 = vpop.permute.xlu1 %1572 }
 0x3fe   :  { %v1270_v2 = vpop.f32.mrb[8].mxu0 }
 0x3ff   :  { %v1271_v27 = vadd.f32 %v1270_v2, %v1200_v16  ;;  %v1272_v30 = vpop.f32.mrb[9].mxu0 }
 0x400   :  { %v1273_v29 = vadd.f32 %v1272_v30, %v1200_v16 }
 0x402   :  { %1414 = vmatprep.mubr.f32.mxu0 %v1273_v29 }
 0x403   :  { %1415 = vmatmul.mubr.f32.vlgmr.msra.gmra.mrb[10].mxu0 %v1271_v27 }
 0x404   :  { %1421 = vmatpush1.xpose.msra.mxu0 %v1348_v0 }
 0x405   :  { %1888 = vmatprep.subr.msk.mxu0 %vm1580_vm12, %v1347_v19 }
 0x40d   :  { %v1341_v40 = vpop.f32.mrb[8].mxu1 }
 0x40e   :  { %v1343_v39 = vpop.f32.mrb[9].mxu1  ;;  %v1342_v44 = vadd.f32 %v1341_v40, %v1200_v16 }
 0x40f   :  { %v1344_v32 = vadd.f32 %v1343_v39, %v1200_v16 }
 0x411   :  { %1484 = vmatprep.mubr.f32.mxu0 %v1344_v32 }
 0x412   :  { %1485 = vmatmul.mubr.f32.vlgmr.msra.gmra.mrb[10].mxu0 %v1342_v44 }
 0x413   :  { %1739 = vmatprep.mubr.f32.mxu0 %v3247_v11  ;;  %1889 = vmatpush1.msk.msra.mxu0 %vm1580_vm12, %v1346_v41 }
 0x4e5   :  { %v1486_v54 = vpop.f32.mrb[10].mxu0 }
 0x4e6   :  { %v1488_v15 = vpop.f32.mrb[11].mxu0  ;;  %1899 = vmatpush3.msk.msra.mxu1 %vm85_vm0, %v1486_v54 }
 0x4e7   :  { %1901 = vmatmul.mubr.msk.f32.vlgmr.msra.gmra.mrb[10].mxu1 %vm80_vm1, %v65_v55  ;;  %1903 = vmatprep.subr.mxu1 %v3247_v11 }
 0x4e8   :  { %1905 = vmatprep.mubr.msk.f32.mxu1 %vm2178_vm11, %v3247_v11 }
 0x5ba   :  { %v1566_v5 = vpop.f32.mrb[10].mxu1 }
 0x5bb   :  { %v1567_v37 = vadd.f32 %v1566_v5, %v1493_v59  ;;  %v1902_v18 = vpop.f32.mrb[11].mxu1 }
 0x5bd   :  { %v1570_v35 = vmax.f32 %v1567_v37, 0.0 }
 0x5bf   :  { %1904 = vmatpush3.msk.msra.mxu1 %vm1580_vm12, %v1570_v35 }
 0x5c0   :  { %1906 = vmatmul.mubr.msk.f32.vlgmr.msra.gmra.mrb[12].mxu1 %vm1577_vm13, %v1576_v21  ;;  %1891 = vmatprep.subr.msk.mxu1 %vm1580_vm12, %v1349_v45 }
 0x5c1   :  { %1892 = vmatpush1.msk.msra.mxu1 %vm1580_vm12, %v1348_v0  ;;  %1810 = vmatprep.mubr.f32.mxu1 %v3247_v11 }
 0x693   :  { %v1650_v23 = vpop.f32.mrb[12].mxu1 }
 0x694   :  { %v1651_v34 = vadd.f32 %v1650_v23, %v1573_v56  ;;  %v1907_v36 = vpop.f32.mrb[13].mxu1 }
 0x696   :  { %v1887_v33 = vmul.f32 -1.442695, %v1651_v34 }
 0x698   :  { %2049 = vpow2.f32 %v1887_v33 }
 0x6a2   :  { %v2050_v58 = vpop.eup %2049 }
 0x6a3   :  { %v1657_v48 = vadd.f32 1.0, %v2050_v58 }
 0x6a5   :  { %2051 = vrcp.f32 %v1657_v48 }
 0x6af   :  { %v2052_v8 = vpop.eup %2051 }
 0x6b0   :  { %1890 = vmatmul.mubr.msk.f32.vlgmr.msra.gmra.mrb[12].mxu0 %vm1577_vm13, %v2052_v8  ;;  %1893 = vmatmul.mubr.msk.f32.vlgmr.msra.gmra.mrb[14].mxu1 %vm1577_vm13, %v2052_v8 }
 0x783   :  { %v1741_v57 = vpop.f32.mrb[12].mxu0  ;;  %v1812_v46 = vpop.f32.mrb[14].mxu1 }
 0x784   :  { %v1817_v17 = vmul.f32 %v1741_v57, %v1271_v27  ;;  %v1819_v28 = vmul.f32 %v1812_v46, %v1342_v44  ;;  %v1743_v7 = vpop.f32.mrb[13].mxu0  ;;  %v1814_v11 = vpop.f32.mrb[15].mxu1 }
 0x785   :  { %v1818_v43 = vmul.f32 %v1743_v7, %v1273_v29  ;;  %v1820_v63 = vmul.f32 %v1814_v11, %v1344_v32 }
 0x786   :  { %v1823_v47 = vadd.f32 %v2053_v38, %v1817_v17  ;;  %v1825_v3 = vadd.f32 %v2054_v24, %v1819_v28 }
 0x787   :  { %v1824_v12 = vadd.f32 %v1818_v43, %v3249_v49  ;;  %v1826_v62 = vadd.f32 %v1820_v63, %v3250_v52 }
 0x789   :  { %v1831_v26 = vcombine.low %v1823_v47, %v1824_v12  ;;  %v1832_v20 = vcombine.low %v1825_v3, %v1826_v62 }
 0x78b   :  { %1835 = vst [vmem:[#allocation8] sm:$0xff] %v1831_v26  ;;  %1836 = vst [vmem:[#allocation8 + $0x8] sm:$0xff] %v1832_v20 }
 0x78c   :  { %2132 = shalt.err (!%p2129_p0)
}
 0x78d   :  { %s2133_s20 = scalar_lea.hbm %s3100_s5, 256 }
 0x78e   :  { %p2134_p1 = scmp.ne.s32.totalorder %s3100_s5, %s2133_s20  ;;  %p2137_p2 = scmp.lt.u32.totalorder %s2133_s20, %s3100_s5 }
 0x790   :  { %p2139_p3 = pnand %p2137_p2, %p2134_p1 }
 0x792   :  { %2142 = shalt.err (!%p2139_p3)
}
 0x793   :  { %1846 = dma.vmem_to_hbm [thread:$0]  %s1844_s17, 256, %s3100_s5, [#allocation4]  }
 0x794   :  { %2147 = dma.done.wait [#allocation4], 256  }
 0x795   :  { %2148 = vsyncadd [#allocation4], 4294967040 }
 0x796   :  { %1850 = vsyncpa [#allocation3], 1 }
 0x797   :  { %1851 = vsyncpa [#allocation6], 1 }
 0x798   :  { %1852 = vsyncpa [#allocation4], 1 }

</bundles_post_ra>
